<compile_context>
chip_gen: v6e
topology: v6e:2x2x1
jax: 0.10.0
libtpu: 0.0.40
codegen_flags: <defaults>
</compile_context>

<pallas_src>
import functools

import jax
import jax.numpy as jnp
from jax.experimental import pallas as pl
from jax.experimental.pallas import tpu as pltpu


def _conv3x3_s2_kernel(x_ref, w_ref, b_ref, o_ref, *, Ho, Wo, Hh, Cin,
                       rows_per_chunk):
    """3x3 / stride-2 / pad-1 conv on a phase-decomposed NHWC plane.

    x_ref: (4*Hh, Wh, Cin) bf16. Rows [p*Hh, (p+1)*Hh) hold phase plane
           p = 2*(row parity) + (col parity) of the zero-padded input:
           plane_p[i, j, :] = x_pad[2*i + p//2, 2*j + p%2, :].
    w_ref: (9*Cin, Cout) bf16, tap-major along K (tap t = kh*3 + kw).
    b_ref: (1, Cout) f32.
    o_ref: (Ho, Wo, Cout).
    """
    Cout = o_ref.shape[-1]
    bias = b_ref[...].astype(jnp.float32)            # (1, Cout), hoisted once

    # Static Python loop over output-row chunks: M = rc*Wo per matmul.
    for r0 in range(0, Ho, rows_per_chunk):
        r1 = min(r0 + rows_per_chunk, Ho)
        rc = r1 - r0
        acc = jnp.zeros((rc * Wo, Cout), jnp.float32)
        for kh in range(3):
            for kw in range(3):
                p = (kh % 2) * 2 + (kw % 2)
                rs = p * Hh + kh // 2 + r0
                cs = kw // 2
                # Contiguous STATIC slice (no stride-2, no dynamic scalars).
                slab = x_ref[rs:rs + rc, cs:cs + Wo, :]      # (rc, Wo, Cin)
                t = kh * 3 + kw
                acc += jnp.dot(slab.reshape(rc * Wo, Cin),
                               w_ref[t * Cin:(t + 1) * Cin, :],
                               preferred_element_type=jnp.float32)
        o_ref[r0:r1, :, :] = (acc + bias).reshape(rc, Wo, Cout).astype(o_ref.dtype)


def _make_phases(x_nhwc):
    """bf16 cast + zero pad(1) + stride-2 phase split, as one fused XLA pass.

    Returns ((N, 4*Hh, Wh, C) bf16, Hh, Wh) where rows [p*Hh, (p+1)*Hh) hold
    x_pad[p//2::2, p%2::2, :] of the 1-padded plane.  Hh = Ho+1, Wh = Wo+1.
    """
    N, H, W, C = x_nhwc.shape
    Hh = (H + 3) // 2
    Wh = (W + 3) // 2
    xp = jnp.pad(x_nhwc.astype(jnp.bfloat16),
                 ((0, 0), (1, 2 * Hh - H - 1), (1, 2 * Wh - W - 1), (0, 0)))
    xph = xp.reshape(N, Hh, 2, Wh, 2, C).transpose(0, 2, 4, 1, 3, 5)
    return xph.reshape(N, 4 * Hh, Wh, C), Hh, Wh


def _conv3x3_s2_p1_nhwc(x_nhwc, w_packed_bf16, bias_row_f32, *, target_m=256):
    """nn.Conv2d(Cin, Cout, 3, stride=2, padding=1) on an NHWC tensor (Pallas)."""
    N, H, W, Cin = x_nhwc.shape
    Cout = w_packed_bf16.shape[-1]
    Ho = (H - 1) // 2 + 1
    Wo = (W - 1) // 2 + 1

    x_ph, Hh, Wh = _make_phases(x_nhwc)
    rows_per_chunk = int(max(1, min(Ho, pl.cdiv(target_m, Wo))))

    in_bytes = 4 * Hh * Wh * Cin * 2
    out_bytes = Ho * Wo * Cout * jnp.dtype(x_nhwc.dtype).itemsize
    w_bytes = 9 * Cin * Cout * 2 + Cout * 4
    vmem_limit = int(min(max(2 * (in_bytes + out_bytes + w_bytes) + (4 << 20),
                             32 << 20), 60 << 20))

    kernel = functools.partial(_conv3x3_s2_kernel, Ho=Ho, Wo=Wo, Hh=Hh,
                               Cin=Cin, rows_per_chunk=rows_per_chunk)
    return pl.pallas_call(
        kernel,
        out_shape=jax.ShapeDtypeStruct((N, Ho, Wo, Cout), x_nhwc.dtype),
        grid=(N,),
        in_specs=[
            # Full phase-plane of one image; resident in VMEM for that step.
            pl.BlockSpec((None, 4 * Hh, Wh, Cin), lambda n: (n, 0, 0, 0)),
            # Weights / bias: constant index_map -> no per-step re-DMA.
            pl.BlockSpec((9 * Cin, Cout), lambda n: (0, 0)),
            pl.BlockSpec((1, Cout), lambda n: (0, 0)),
        ],
        out_specs=pl.BlockSpec((None, Ho, Wo, Cout), lambda n: (n, 0, 0, 0)),
        compiler_params=pltpu.CompilerParams(
            dimension_semantics=("parallel",),
            vmem_limit_bytes=vmem_limit),
    )(x_ph, w_packed_bf16, bias_row_f32)


def _pack_taps(weight_oihw):
    """(Cout, Cin, 3, 3) -> (9*Cin, Cout) bf16, K index = (kh*3 + kw)*Cin + ci."""
    cout, cin, k, _ = weight_oihw.shape
    return (jnp.transpose(weight_oihw, (2, 3, 1, 0))
            .reshape(k * k * cin, cout)
            .astype(jnp.bfloat16))


class LastLevelP6P7:
    """JAX/Pallas port of maskrcnn_benchmark LastLevelP6P7."""

    def __init__(self, in_channels, out_channels, key):
        k6, k7 = jax.random.split(key)

        def kaiming_uniform(k, cout, cin):
            # nn.init.kaiming_uniform_(w, a=1): bound = sqrt(3 / fan_in)
            fan_in = cin * 3 * 3
            bound = (3.0 / fan_in) ** 0.5
            return jax.random.uniform(k, (cout, cin, 3, 3), jnp.float32, -bound, bound)

        self.p6_w = kaiming_uniform(k6, out_channels, in_channels)
        self.p6_b = jnp.zeros((out_channels,), jnp.float32)
        self.p7_w = kaiming_uniform(k7, out_channels, out_channels)
        self.p7_b = jnp.zeros((out_channels,), jnp.float32)
        self.use_P5 = in_channels == out_channels

        # Pre-packed kernel operands (done once, not per call).
        self._p6_wt = _pack_taps(self.p6_w)
        self._p7_wt = _pack_taps(self.p7_w)
        self._p6_br = self.p6_b.reshape(1, -1).astype(jnp.float32)
        self._p7_br = self.p7_b.reshape(1, -1).astype(jnp.float32)

    def __call__(self, c5, p5):
        x = p5 if self.use_P5 else c5
        x_nhwc = jnp.transpose(x, (0, 2, 3, 1))      # single NCHW->NHWC at boundary
        p6_nhwc = _conv3x3_s2_p1_nhwc(x_nhwc, self._p6_wt, self._p6_br)
        # F.relu(p6): applied once, fused with the bf16 phase-prep of the p7 input.
        p7_nhwc = _conv3x3_s2_p1_nhwc(jnp.maximum(p6_nhwc, 0.0),
                                      self._p7_wt, self._p7_br)
        p6 = jnp.transpose(p6_nhwc, (0, 3, 1, 2))    # back to NCHW at boundary
        p7 = jnp.transpose(p7_nhwc, (0, 3, 1, 2))
        return [p6, p7]


def _ref_conv(x, w, b, relu_input=False):
    """XLA reference with the same bf16-operand / f32-accumulate recipe."""
    if relu_input:
        x = jnp.maximum(x, 0.0)
    out = jax.lax.conv_general_dilated(
        x.astype(jnp.bfloat16), w.astype(jnp.bfloat16),
        window_strides=(2, 2), padding=((1, 1), (1, 1)),
        dimension_numbers=('NCHW', 'OIHW', 'NCHW'),
        preferred_element_type=jnp.float32)
    return out + b.reshape(1, -1, 1, 1)


if __name__ == "__main__":
    key = jax.random.PRNGKey(0)
    k_params, k_c5, k_p5 = jax.random.split(key, 3)

    in_channels, out_channels = 4, 8          # in != out  ->  use_P5 = False (uses c5)
    N, H, W = 2, 16, 16

    c5 = jax.random.normal(k_c5, (N, in_channels, H, W), jnp.float32)
    p5 = jax.random.normal(k_p5, (N, out_channels, H // 2, W // 2), jnp.float32)

    module = LastLevelP6P7(in_channels, out_channels, k_params)
    fwd = jax.jit(module.__call__)
    p6, p7 = fwd(c5, p5)
    jax.block_until_ready(p6)
    jax.block_until_ready(p7)

    assert p6.shape == (N, out_channels, H // 2, W // 2), p6.shape
    assert p7.shape == (N, out_channels, H // 4, W // 4), p7.shape

    # Cross-check against XLA's conv to validate Pallas kernel semantics.
    p6_ref = _ref_conv(c5, module.p6_w, module.p6_b)
    p7_ref = _ref_conv(p6_ref, module.p7_w, module.p7_b, relu_input=True)
    assert jnp.allclose(p6, p6_ref, atol=5e-3, rtol=5e-3), \
        float(jnp.max(jnp.abs(p6 - p6_ref)))
    assert jnp.allclose(p7, p7_ref, atol=5e-3, rtol=5e-3), \
        float(jnp.max(jnp.abs(p7 - p7_ref)))

    print("KERNEL_OK")
</pallas_src>

<mosaic_0001>
module attributes {stable_mosaic.version = 11 : i64} {
  func.func @_conv3x3_s2_kernel(%arg0: i32, %arg1: memref<1x36x9x4xbf16, #tpu.memory_space<vmem>>, %arg2: memref<36x8xbf16, #tpu.memory_space<vmem>>, %arg3: memref<1x8xf32, #tpu.memory_space<vmem>>, %arg4: memref<1x8x8x8xf32, #tpu.memory_space<vmem>>) attributes {dimension_semantics = [#tpu.dimension_semantics<parallel>], iteration_bounds = array<i64: 2>, scalar_prefetch = 0 : i64, scratch_operands = 0 : i64, tpu.core_type = #tpu.core_type<tc>, window_params = [{transform_indices = @transform_0, window_bounds = array<i64: 1, 36, 9, 4>}, {pipeline_mode = #tpu.pipeline_mode<synchronous>, transform_indices = @transform_1, window_bounds = array<i64: 36, 8>}, {pipeline_mode = #tpu.pipeline_mode<synchronous>, transform_indices = @transform_2, window_bounds = array<i64: 1, 8>}, {transform_indices = @transform_3, window_bounds = array<i64: 1, 8, 8, 8>}]} {
    %c0 = arith.constant 0 : index
    %c0_0 = arith.constant 0 : index
    %0 = vector.load %arg3[%c0, %c0_0] : memref<1x8xf32, #tpu.memory_space<vmem>>, vector<1x8xf32>
    %cst = arith.constant 0.000000e+00 : f32
    %1 = vector.broadcast %cst : f32 to vector<64x8xf32>
    %c0_1 = arith.constant 0 : index
    %c0_2 = arith.constant 0 : index
    %c0_3 = arith.constant 0 : index
    %c0_4 = arith.constant 0 : index
    %2 = vector.load %arg1[%c0_1, %c0_2, %c0_3, %c0_4] : memref<1x36x9x4xbf16, #tpu.memory_space<vmem>>, vector<1x8x8x4xbf16>
    %3 = vector.shape_cast %2 : vector<1x8x8x4xbf16> to vector<8x8x4xbf16>
    %4 = vector.shape_cast %3 : vector<8x8x4xbf16> to vector<64x4xbf16>
    %c0_5 = arith.constant 0 : index
    %c0_6 = arith.constant 0 : index
    %5 = vector.load %arg2[%c0_5, %c0_6] : memref<36x8xbf16, #tpu.memory_space<vmem>>, vector<4x8xbf16>
    %cst_7 = arith.constant dense<0.000000e+00> : vector<64x8xf32>
    %6 = tpu.matmul %4, %5, %cst_7 {dimension_numbers = #tpu.dot_dimension_numbers<[1], [0], [0], [1], [0, 0, 1, 1], [], []>} : vector<64x4xbf16>, vector<4x8xbf16>, vector<64x8xf32> -> vector<64x8xf32>
    %7 = arith.addf %1, %6 : vector<64x8xf32>
    %c0_8 = arith.constant 0 : index
    %c9 = arith.constant 9 : index
    %c0_9 = arith.constant 0 : index
    %c0_10 = arith.constant 0 : index
    %8 = vector.load %arg1[%c0_8, %c9, %c0_9, %c0_10] : memref<1x36x9x4xbf16, #tpu.memory_space<vmem>>, vector<1x8x8x4xbf16>
    %9 = vector.shape_cast %8 : vector<1x8x8x4xbf16> to vector<8x8x4xbf16>
    %10 = vector.shape_cast %9 : vector<8x8x4xbf16> to vector<64x4xbf16>
    %c4 = arith.constant 4 : index
    %c0_11 = arith.constant 0 : index
    %11 = vector.load %arg2[%c4, %c0_11] : memref<36x8xbf16, #tpu.memory_space<vmem>>, vector<4x8xbf16>
    %cst_12 = arith.constant dense<0.000000e+00> : vector<64x8xf32>
    %12 = tpu.matmul %10, %11, %cst_12 {dimension_numbers = #tpu.dot_dimension_numbers<[1], [0], [0], [1], [0, 0, 1, 1], [], []>} : vector<64x4xbf16>, vector<4x8xbf16>, vector<64x8xf32> -> vector<64x8xf32>
    %13 = arith.addf %7, %12 : vector<64x8xf32>
    %c0_13 = arith.constant 0 : index
    %c0_14 = arith.constant 0 : index
    %c1 = arith.constant 1 : index
    %c0_15 = arith.constant 0 : index
    %14 = vector.load %arg1[%c0_13, %c0_14, %c1, %c0_15] : memref<1x36x9x4xbf16, #tpu.memory_space<vmem>>, vector<1x8x8x4xbf16>
    %15 = vector.shape_cast %14 : vector<1x8x8x4xbf16> to vector<8x8x4xbf16>
    %16 = vector.shape_cast %15 : vector<8x8x4xbf16> to vector<64x4xbf16>
    %c8 = arith.constant 8 : index
    %c0_16 = arith.constant 0 : index
    %17 = vector.load %arg2[%c8, %c0_16] : memref<36x8xbf16, #tpu.memory_space<vmem>>, vector<4x8xbf16>
    %cst_17 = arith.constant dense<0.000000e+00> : vector<64x8xf32>
    %18 = tpu.matmul %16, %17, %cst_17 {dimension_numbers = #tpu.dot_dimension_numbers<[1], [0], [0], [1], [0, 0, 1, 1], [], []>} : vector<64x4xbf16>, vector<4x8xbf16>, vector<64x8xf32> -> vector<64x8xf32>
    %19 = arith.addf %13, %18 : vector<64x8xf32>
    %c0_18 = arith.constant 0 : index
    %c18 = arith.constant 18 : index
    %c0_19 = arith.constant 0 : index
    %c0_20 = arith.constant 0 : index
    %20 = vector.load %arg1[%c0_18, %c18, %c0_19, %c0_20] : memref<1x36x9x4xbf16, #tpu.memory_space<vmem>>, vector<1x8x8x4xbf16>
    %21 = vector.shape_cast %20 : vector<1x8x8x4xbf16> to vector<8x8x4xbf16>
    %22 = vector.shape_cast %21 : vector<8x8x4xbf16> to vector<64x4xbf16>
    %c12 = arith.constant 12 : index
    %c0_21 = arith.constant 0 : index
    %23 = vector.load %arg2[%c12, %c0_21] : memref<36x8xbf16, #tpu.memory_space<vmem>>, vector<4x8xbf16>
    %cst_22 = arith.constant dense<0.000000e+00> : vector<64x8xf32>
    %24 = tpu.matmul %22, %23, %cst_22 {dimension_numbers = #tpu.dot_dimension_numbers<[1], [0], [0], [1], [0, 0, 1, 1], [], []>} : vector<64x4xbf16>, vector<4x8xbf16>, vector<64x8xf32> -> vector<64x8xf32>
    %25 = arith.addf %19, %24 : vector<64x8xf32>
    %c0_23 = arith.constant 0 : index
    %c27 = arith.constant 27 : index
    %c0_24 = arith.constant 0 : index
    %c0_25 = arith.constant 0 : index
    %26 = vector.load %arg1[%c0_23, %c27, %c0_24, %c0_25] : memref<1x36x9x4xbf16, #tpu.memory_space<vmem>>, vector<1x8x8x4xbf16>
    %27 = vector.shape_cast %26 : vector<1x8x8x4xbf16> to vector<8x8x4xbf16>
    %28 = vector.shape_cast %27 : vector<8x8x4xbf16> to vector<64x4xbf16>
    %c16 = arith.constant 16 : index
    %c0_26 = arith.constant 0 : index
    %29 = vector.load %arg2[%c16, %c0_26] : memref<36x8xbf16, #tpu.memory_space<vmem>>, vector<4x8xbf16>
    %cst_27 = arith.constant dense<0.000000e+00> : vector<64x8xf32>
    %30 = tpu.matmul %28, %29, %cst_27 {dimension_numbers = #tpu.dot_dimension_numbers<[1], [0], [0], [1], [0, 0, 1, 1], [], []>} : vector<64x4xbf16>, vector<4x8xbf16>, vector<64x8xf32> -> vector<64x8xf32>
    %31 = arith.addf %25, %30 : vector<64x8xf32>
    %c0_28 = arith.constant 0 : index
    %c18_29 = arith.constant 18 : index
    %c1_30 = arith.constant 1 : index
    %c0_31 = arith.constant 0 : index
    %32 = vector.load %arg1[%c0_28, %c18_29, %c1_30, %c0_31] : memref<1x36x9x4xbf16, #tpu.memory_space<vmem>>, vector<1x8x8x4xbf16>
    %33 = vector.shape_cast %32 : vector<1x8x8x4xbf16> to vector<8x8x4xbf16>
    %34 = vector.shape_cast %33 : vector<8x8x4xbf16> to vector<64x4xbf16>
    %c20 = arith.constant 20 : index
    %c0_32 = arith.constant 0 : index
    %35 = vector.load %arg2[%c20, %c0_32] : memref<36x8xbf16, #tpu.memory_space<vmem>>, vector<4x8xbf16>
    %cst_33 = arith.constant dense<0.000000e+00> : vector<64x8xf32>
    %36 = tpu.matmul %34, %35, %cst_33 {dimension_numbers = #tpu.dot_dimension_numbers<[1], [0], [0], [1], [0, 0, 1, 1], [], []>} : vector<64x4xbf16>, vector<4x8xbf16>, vector<64x8xf32> -> vector<64x8xf32>
    %37 = arith.addf %31, %36 : vector<64x8xf32>
    %c0_34 = arith.constant 0 : index
    %c1_35 = arith.constant 1 : index
    %c0_36 = arith.constant 0 : index
    %c0_37 = arith.constant 0 : index
    %38 = vector.load %arg1[%c0_34, %c1_35, %c0_36, %c0_37] : memref<1x36x9x4xbf16, #tpu.memory_space<vmem>>, vector<1x8x8x4xbf16>
    %39 = vector.shape_cast %38 : vector<1x8x8x4xbf16> to vector<8x8x4xbf16>
    %40 = vector.shape_cast %39 : vector<8x8x4xbf16> to vector<64x4xbf16>
    %c24 = arith.constant 24 : index
    %c0_38 = arith.constant 0 : index
    %41 = vector.load %arg2[%c24, %c0_38] : memref<36x8xbf16, #tpu.memory_space<vmem>>, vector<4x8xbf16>
    %cst_39 = arith.constant dense<0.000000e+00> : vector<64x8xf32>
    %42 = tpu.matmul %40, %41, %cst_39 {dimension_numbers = #tpu.dot_dimension_numbers<[1], [0], [0], [1], [0, 0, 1, 1], [], []>} : vector<64x4xbf16>, vector<4x8xbf16>, vector<64x8xf32> -> vector<64x8xf32>
    %43 = arith.addf %37, %42 : vector<64x8xf32>
    %c0_40 = arith.constant 0 : index
    %c10 = arith.constant 10 : index
    %c0_41 = arith.constant 0 : index
    %c0_42 = arith.constant 0 : index
    %44 = vector.load %arg1[%c0_40, %c10, %c0_41, %c0_42] : memref<1x36x9x4xbf16, #tpu.memory_space<vmem>>, vector<1x8x8x4xbf16>
    %45 = vector.shape_cast %44 : vector<1x8x8x4xbf16> to vector<8x8x4xbf16>
    %46 = vector.shape_cast %45 : vector<8x8x4xbf16> to vector<64x4xbf16>
    %c28 = arith.constant 28 : index
    %c0_43 = arith.constant 0 : index
    %47 = vector.load %arg2[%c28, %c0_43] : memref<36x8xbf16, #tpu.memory_space<vmem>>, vector<4x8xbf16>
    %cst_44 = arith.constant dense<0.000000e+00> : vector<64x8xf32>
    %48 = tpu.matmul %46, %47, %cst_44 {dimension_numbers = #tpu.dot_dimension_numbers<[1], [0], [0], [1], [0, 0, 1, 1], [], []>} : vector<64x4xbf16>, vector<4x8xbf16>, vector<64x8xf32> -> vector<64x8xf32>
    %49 = arith.addf %43, %48 : vector<64x8xf32>
    %c0_45 = arith.constant 0 : index
    %c1_46 = arith.constant 1 : index
    %c1_47 = arith.constant 1 : index
    %c0_48 = arith.constant 0 : index
    %50 = vector.load %arg1[%c0_45, %c1_46, %c1_47, %c0_48] : memref<1x36x9x4xbf16, #tpu.memory_space<vmem>>, vector<1x8x8x4xbf16>
    %51 = vector.shape_cast %50 : vector<1x8x8x4xbf16> to vector<8x8x4xbf16>
    %52 = vector.shape_cast %51 : vector<8x8x4xbf16> to vector<64x4xbf16>
    %c32 = arith.constant 32 : index
    %c0_49 = arith.constant 0 : index
    %53 = vector.load %arg2[%c32, %c0_49] : memref<36x8xbf16, #tpu.memory_space<vmem>>, vector<4x8xbf16>
    %cst_50 = arith.constant dense<0.000000e+00> : vector<64x8xf32>
    %54 = tpu.matmul %52, %53, %cst_50 {dimension_numbers = #tpu.dot_dimension_numbers<[1], [0], [0], [1], [0, 0, 1, 1], [], []>} : vector<64x4xbf16>, vector<4x8xbf16>, vector<64x8xf32> -> vector<64x8xf32>
    %55 = arith.addf %49, %54 : vector<64x8xf32>
    %56 = vector.broadcast %0 : vector<1x8xf32> to vector<64x8xf32>
    %57 = arith.addf %55, %56 : vector<64x8xf32>
    %58 = vector.shape_cast %57 : vector<64x8xf32> to vector<8x8x8xf32>
    %c0_51 = arith.constant 0 : index
    %c0_52 = arith.constant 0 : index
    %c0_53 = arith.constant 0 : index
    %c0_54 = arith.constant 0 : index
    %59 = vector.load %arg4[%c0_51, %c0_52, %c0_53, %c0_54] : memref<1x8x8x8xf32, #tpu.memory_space<vmem>>, vector<1x8x8x8xf32>
    %60 = vector.shape_cast %59 : vector<1x8x8x8xf32> to vector<8x8x8xf32>
    %61 = vector.shape_cast %58 : vector<8x8x8xf32> to vector<1x8x8x8xf32>
    tpu.vector_store %arg4[%c0_51, %c0_52, %c0_53, %c0_54], %61 {strides = array<i32>} : memref<1x8x8x8xf32, #tpu.memory_space<vmem>>, vector<1x8x8x8xf32>,
    return
  }
  func.func @transform_0(%arg0: i32) -> (i32, i32, i32, i32) {
    %c0_i32 = arith.constant 0 : i32
    %c0_i32_0 = arith.constant 0 : i32
    %c0_i32_1 = arith.constant 0 : i32
    %c0_i32_2 = arith.constant 0 : i32
    return %arg0, %c0_i32, %c0_i32_0, %c0_i32_1 : i32, i32, i32, i32
  }
  func.func @transform_1(%arg0: i32) -> (i32, i32) {
    %c0_i32 = arith.constant 0 : i32
    %c0_i32_0 = arith.constant 0 : i32
    %c0_i32_1 = arith.constant 0 : i32
    return %c0_i32, %c0_i32_0 : i32, i32
  }
  func.func @transform_2(%arg0: i32) -> (i32, i32) {
    %c0_i32 = arith.constant 0 : i32
    %c0_i32_0 = arith.constant 0 : i32
    %c0_i32_1 = arith.constant 0 : i32
    return %c0_i32, %c0_i32_0 : i32, i32
  }
  func.func @transform_3(%arg0: i32) -> (i32, i32, i32, i32) {
    %c0_i32 = arith.constant 0 : i32
    %c0_i32_0 = arith.constant 0 : i32
    %c0_i32_1 = arith.constant 0 : i32
    %c0_i32_2 = arith.constant 0 : i32
    return %arg0, %c0_i32, %c0_i32_0, %c0_i32_1 : i32, i32, i32, i32
  }
}

module attributes {stable_mosaic.version = 11 : i64} {
  func.func @_conv3x3_s2_kernel(%arg0: i32, %arg1: memref<1x20x5x8xbf16, #tpu.memory_space<vmem>>, %arg2: memref<72x8xbf16, #tpu.memory_space<vmem>>, %arg3: memref<1x8xf32, #tpu.memory_space<vmem>>, %arg4: memref<1x4x4x8xf32, #tpu.memory_space<vmem>>) attributes {dimension_semantics = [#tpu.dimension_semantics<parallel>], iteration_bounds = array<i64: 2>, scalar_prefetch = 0 : i64, scratch_operands = 0 : i64, tpu.core_type = #tpu.core_type<tc>, window_params = [{transform_indices = @transform_0, window_bounds = array<i64: 1, 20, 5, 8>}, {pipeline_mode = #tpu.pipeline_mode<synchronous>, transform_indices = @transform_1, window_bounds = array<i64: 72, 8>}, {pipeline_mode = #tpu.pipeline_mode<synchronous>, transform_indices = @transform_2, window_bounds = array<i64: 1, 8>}, {transform_indices = @transform_3, window_bounds = array<i64: 1, 4, 4, 8>}]} {
    %c0 = arith.constant 0 : index
    %c0_0 = arith.constant 0 : index
    %0 = vector.load %arg3[%c0, %c0_0] : memref<1x8xf32, #tpu.memory_space<vmem>>, vector<1x8xf32>
    %cst = arith.constant 0.000000e+00 : f32
    %1 = vector.broadcast %cst : f32 to vector<16x8xf32>
    %c0_1 = arith.constant 0 : index
    %c0_2 = arith.constant 0 : index
    %c0_3 = arith.constant 0 : index
    %c0_4 = arith.constant 0 : index
    %2 = vector.load %arg1[%c0_1, %c0_2, %c0_3, %c0_4] : memref<1x20x5x8xbf16, #tpu.memory_space<vmem>>, vector<1x4x4x8xbf16>
    %3 = vector.shape_cast %2 : vector<1x4x4x8xbf16> to vector<4x4x8xbf16>
    %4 = vector.shape_cast %3 : vector<4x4x8xbf16> to vector<16x8xbf16>
    %c0_5 = arith.constant 0 : index
    %c0_6 = arith.constant 0 : index
    %5 = vector.load %arg2[%c0_5, %c0_6] : memref<72x8xbf16, #tpu.memory_space<vmem>>, vector<8x8xbf16>
    %cst_7 = arith.constant dense<0.000000e+00> : vector<16x8xf32>
    %6 = tpu.matmul %4, %5, %cst_7 {dimension_numbers = #tpu.dot_dimension_numbers<[1], [0], [0], [1], [0, 0, 1, 1], [], []>} : vector<16x8xbf16>, vector<8x8xbf16>, vector<16x8xf32> -> vector<16x8xf32>
    %7 = arith.addf %1, %6 : vector<16x8xf32>
    %c0_8 = arith.constant 0 : index
    %c5 = arith.constant 5 : index
    %c0_9 = arith.constant 0 : index
    %c0_10 = arith.constant 0 : index
    %8 = vector.load %arg1[%c0_8, %c5, %c0_9, %c0_10] : memref<1x20x5x8xbf16, #tpu.memory_space<vmem>>, vector<1x4x4x8xbf16>
    %9 = vector.shape_cast %8 : vector<1x4x4x8xbf16> to vector<4x4x8xbf16>
    %10 = vector.shape_cast %9 : vector<4x4x8xbf16> to vector<16x8xbf16>
    %c8 = arith.constant 8 : index
    %c0_11 = arith.constant 0 : index
    %11 = vector.load %arg2[%c8, %c0_11] : memref<72x8xbf16, #tpu.memory_space<vmem>>, vector<8x8xbf16>
    %cst_12 = arith.constant dense<0.000000e+00> : vector<16x8xf32>
    %12 = tpu.matmul %10, %11, %cst_12 {dimension_numbers = #tpu.dot_dimension_numbers<[1], [0], [0], [1], [0, 0, 1, 1], [], []>} : vector<16x8xbf16>, vector<8x8xbf16>, vector<16x8xf32> -> vector<16x8xf32>
    %13 = arith.addf %7, %12 : vector<16x8xf32>
    %c0_13 = arith.constant 0 : index
    %c0_14 = arith.constant 0 : index
    %c1 = arith.constant 1 : index
    %c0_15 = arith.constant 0 : index
    %14 = vector.load %arg1[%c0_13, %c0_14, %c1, %c0_15] : memref<1x20x5x8xbf16, #tpu.memory_space<vmem>>, vector<1x4x4x8xbf16>
    %15 = vector.shape_cast %14 : vector<1x4x4x8xbf16> to vector<4x4x8xbf16>
    %16 = vector.shape_cast %15 : vector<4x4x8xbf16> to vector<16x8xbf16>
    %c16 = arith.constant 16 : index
    %c0_16 = arith.constant 0 : index
    %17 = vector.load %arg2[%c16, %c0_16] : memref<72x8xbf16, #tpu.memory_space<vmem>>, vector<8x8xbf16>
    %cst_17 = arith.constant dense<0.000000e+00> : vector<16x8xf32>
    %18 = tpu.matmul %16, %17, %cst_17 {dimension_numbers = #tpu.dot_dimension_numbers<[1], [0], [0], [1], [0, 0, 1, 1], [], []>} : vector<16x8xbf16>, vector<8x8xbf16>, vector<16x8xf32> -> vector<16x8xf32>
    %19 = arith.addf %13, %18 : vector<16x8xf32>
    %c0_18 = arith.constant 0 : index
    %c10 = arith.constant 10 : index
    %c0_19 = arith.constant 0 : index
    %c0_20 = arith.constant 0 : index
    %20 = vector.load %arg1[%c0_18, %c10, %c0_19, %c0_20] : memref<1x20x5x8xbf16, #tpu.memory_space<vmem>>, vector<1x4x4x8xbf16>
    %21 = vector.shape_cast %20 : vector<1x4x4x8xbf16> to vector<4x4x8xbf16>
    %22 = vector.shape_cast %21 : vector<4x4x8xbf16> to vector<16x8xbf16>
    %c24 = arith.constant 24 : index
    %c0_21 = arith.constant 0 : index
    %23 = vector.load %arg2[%c24, %c0_21] : memref<72x8xbf16, #tpu.memory_space<vmem>>, vector<8x8xbf16>
    %cst_22 = arith.constant dense<0.000000e+00> : vector<16x8xf32>
    %24 = tpu.matmul %22, %23, %cst_22 {dimension_numbers = #tpu.dot_dimension_numbers<[1], [0], [0], [1], [0, 0, 1, 1], [], []>} : vector<16x8xbf16>, vector<8x8xbf16>, vector<16x8xf32> -> vector<16x8xf32>
    %25 = arith.addf %19, %24 : vector<16x8xf32>
    %c0_23 = arith.constant 0 : index
    %c15 = arith.constant 15 : index
    %c0_24 = arith.constant 0 : index
    %c0_25 = arith.constant 0 : index
    %26 = vector.load %arg1[%c0_23, %c15, %c0_24, %c0_25] : memref<1x20x5x8xbf16, #tpu.memory_space<vmem>>, vector<1x4x4x8xbf16>
    %27 = vector.shape_cast %26 : vector<1x4x4x8xbf16> to vector<4x4x8xbf16>
    %28 = vector.shape_cast %27 : vector<4x4x8xbf16> to vector<16x8xbf16>
    %c32 = arith.constant 32 : index
    %c0_26 = arith.constant 0 : index
    %29 = vector.load %arg2[%c32, %c0_26] : memref<72x8xbf16, #tpu.memory_space<vmem>>, vector<8x8xbf16>
    %cst_27 = arith.constant dense<0.000000e+00> : vector<16x8xf32>
    %30 = tpu.matmul %28, %29, %cst_27 {dimension_numbers = #tpu.dot_dimension_numbers<[1], [0], [0], [1], [0, 0, 1, 1], [], []>} : vector<16x8xbf16>, vector<8x8xbf16>, vector<16x8xf32> -> vector<16x8xf32>
    %31 = arith.addf %25, %30 : vector<16x8xf32>
    %c0_28 = arith.constant 0 : index
    %c10_29 = arith.constant 10 : index
    %c1_30 = arith.constant 1 : index
    %c0_31 = arith.constant 0 : index
    %32 = vector.load %arg1[%c0_28, %c10_29, %c1_30, %c0_31] : memref<1x20x5x8xbf16, #tpu.memory_space<vmem>>, vector<1x4x4x8xbf16>
    %33 = vector.shape_cast %32 : vector<1x4x4x8xbf16> to vector<4x4x8xbf16>
    %34 = vector.shape_cast %33 : vector<4x4x8xbf16> to vector<16x8xbf16>
    %c40 = arith.constant 40 : index
    %c0_32 = arith.constant 0 : index
    %35 = vector.load %arg2[%c40, %c0_32] : memref<72x8xbf16, #tpu.memory_space<vmem>>, vector<8x8xbf16>
    %cst_33 = arith.constant dense<0.000000e+00> : vector<16x8xf32>
    %36 = tpu.matmul %34, %35, %cst_33 {dimension_numbers = #tpu.dot_dimension_numbers<[1], [0], [0], [1], [0, 0, 1, 1], [], []>} : vector<16x8xbf16>, vector<8x8xbf16>, vector<16x8xf32> -> vector<16x8xf32>
    %37 = arith.addf %31, %36 : vector<16x8xf32>
    %c0_34 = arith.constant 0 : index
    %c1_35 = arith.constant 1 : index
    %c0_36 = arith.constant 0 : index
    %c0_37 = arith.constant 0 : index
    %38 = vector.load %arg1[%c0_34, %c1_35, %c0_36, %c0_37] : memref<1x20x5x8xbf16, #tpu.memory_space<vmem>>, vector<1x4x4x8xbf16>
    %39 = vector.shape_cast %38 : vector<1x4x4x8xbf16> to vector<4x4x8xbf16>
    %40 = vector.shape_cast %39 : vector<4x4x8xbf16> to vector<16x8xbf16>
    %c48 = arith.constant 48 : index
    %c0_38 = arith.constant 0 : index
    %41 = vector.load %arg2[%c48, %c0_38] : memref<72x8xbf16, #tpu.memory_space<vmem>>, vector<8x8xbf16>
    %cst_39 = arith.constant dense<0.000000e+00> : vector<16x8xf32>
    %42 = tpu.matmul %40, %41, %cst_39 {dimension_numbers = #tpu.dot_dimension_numbers<[1], [0], [0], [1], [0, 0, 1, 1], [], []>} : vector<16x8xbf16>, vector<8x8xbf16>, vector<16x8xf32> -> vector<16x8xf32>
    %43 = arith.addf %37, %42 : vector<16x8xf32>
    %c0_40 = arith.constant 0 : index
    %c6 = arith.constant 6 : index
    %c0_41 = arith.constant 0 : index
    %c0_42 = arith.constant 0 : index
    %44 = vector.load %arg1[%c0_40, %c6, %c0_41, %c0_42] : memref<1x20x5x8xbf16, #tpu.memory_space<vmem>>, vector<1x4x4x8xbf16>
    %45 = vector.shape_cast %44 : vector<1x4x4x8xbf16> to vector<4x4x8xbf16>
    %46 = vector.shape_cast %45 : vector<4x4x8xbf16> to vector<16x8xbf16>
    %c56 = arith.constant 56 : index
    %c0_43 = arith.constant 0 : index
    %47 = vector.load %arg2[%c56, %c0_43] : memref<72x8xbf16, #tpu.memory_space<vmem>>, vector<8x8xbf16>
    %cst_44 = arith.constant dense<0.000000e+00> : vector<16x8xf32>
    %48 = tpu.matmul %46, %47, %cst_44 {dimension_numbers = #tpu.dot_dimension_numbers<[1], [0], [0], [1], [0, 0, 1, 1], [], []>} : vector<16x8xbf16>, vector<8x8xbf16>, vector<16x8xf32> -> vector<16x8xf32>
    %49 = arith.addf %43, %48 : vector<16x8xf32>
    %c0_45 = arith.constant 0 : index
    %c1_46 = arith.constant 1 : index
    %c1_47 = arith.constant 1 : index
    %c0_48 = arith.constant 0 : index
    %50 = vector.load %arg1[%c0_45, %c1_46, %c1_47, %c0_48] : memref<1x20x5x8xbf16, #tpu.memory_space<vmem>>, vector<1x4x4x8xbf16>
    %51 = vector.shape_cast %50 : vector<1x4x4x8xbf16> to vector<4x4x8xbf16>
    %52 = vector.shape_cast %51 : vector<4x4x8xbf16> to vector<16x8xbf16>
    %c64 = arith.constant 64 : index
    %c0_49 = arith.constant 0 : index
    %53 = vector.load %arg2[%c64, %c0_49] : memref<72x8xbf16, #tpu.memory_space<vmem>>, vector<8x8xbf16>
    %cst_50 = arith.constant dense<0.000000e+00> : vector<16x8xf32>
    %54 = tpu.matmul %52, %53, %cst_50 {dimension_numbers = #tpu.dot_dimension_numbers<[1], [0], [0], [1], [0, 0, 1, 1], [], []>} : vector<16x8xbf16>, vector<8x8xbf16>, vector<16x8xf32> -> vector<16x8xf32>
    %55 = arith.addf %49, %54 : vector<16x8xf32>
    %56 = vector.broadcast %0 : vector<1x8xf32> to vector<16x8xf32>
    %57 = arith.addf %55, %56 : vector<16x8xf32>
    %58 = vector.shape_cast %57 : vector<16x8xf32> to vector<4x4x8xf32>
    %c0_51 = arith.constant 0 : index
    %c0_52 = arith.constant 0 : index
    %c0_53 = arith.constant 0 : index
    %c0_54 = arith.constant 0 : index
    %59 = vector.load %arg4[%c0_51, %c0_52, %c0_53, %c0_54] : memref<1x4x4x8xf32, #tpu.memory_space<vmem>>, vector<1x4x4x8xf32>
    %60 = vector.shape_cast %59 : vector<1x4x4x8xf32> to vector<4x4x8xf32>
    %61 = vector.shape_cast %58 : vector<4x4x8xf32> to vector<1x4x4x8xf32>
    tpu.vector_store %arg4[%c0_51, %c0_52, %c0_53, %c0_54], %61 {strides = array<i32>} : memref<1x4x4x8xf32, #tpu.memory_space<vmem>>, vector<1x4x4x8xf32>,
    return
  }
  func.func @transform_0(%arg0: i32) -> (i32, i32, i32, i32) {
    %c0_i32 = arith.constant 0 : i32
    %c0_i32_0 = arith.constant 0 : i32
    %c0_i32_1 = arith.constant 0 : i32
    %c0_i32_2 = arith.constant 0 : i32
    return %arg0, %c0_i32, %c0_i32_0, %c0_i32_1 : i32, i32, i32, i32
  }
  func.func @transform_1(%arg0: i32) -> (i32, i32) {
    %c0_i32 = arith.constant 0 : i32
    %c0_i32_0 = arith.constant 0 : i32
    %c0_i32_1 = arith.constant 0 : i32
    return %c0_i32, %c0_i32_0 : i32, i32
  }
  func.func @transform_2(%arg0: i32) -> (i32, i32) {
    %c0_i32 = arith.constant 0 : i32
    %c0_i32_0 = arith.constant 0 : i32
    %c0_i32_1 = arith.constant 0 : i32
    return %c0_i32, %c0_i32_0 : i32, i32
  }
  func.func @transform_3(%arg0: i32) -> (i32, i32, i32, i32) {
    %c0_i32 = arith.constant 0 : i32
    %c0_i32_0 = arith.constant 0 : i32
    %c0_i32_1 = arith.constant 0 : i32
    %c0_i32_2 = arith.constant 0 : i32
    return %arg0, %c0_i32, %c0_i32_0, %c0_i32_1 : i32, i32, i32, i32
  }
}

</mosaic_0001>

<bundles_post_ra>
// kernel: a_call__.3
= control target key start
LH: loop header
LB: loop body
LE: loop exit
PB: predicated region body
PF: predicated region fallthrough
CT: control target
= control target key end

     0   :  { %8 = vsyncpa [#allocation3], 0  ;;  %s1767_s0 = inlined_call_operand.vmem [shape: bf16[2,20,5,8], index: 0, kind: input, shape index: {}]   ;;  %s1768_s1 = inlined_call_operand.vmem [shape: bf16[72,8], index: 1, kind: input, shape index: {}]   ;;  %s1769_s2 = inlined_call_operand.vmem [shape: f32[1,8], index: 2, kind: input, shape index: {}]   ;;  %s1770_s3 = inlined_call_operand.hbm [shape: f32[2,4,4,8], index: 3, kind: output, shape index: {}]  }
   0x1   :  { %10 = vsyncpa [#allocation3 + $0x1], 0  ;;  %s1506_s12 = smov 0   ;;  %s1508_s13 = smov 0  }
   0x2   :  { %s1510_s14 = smov 0   ;;  %s1512_s15 = smov 0  }
   0x3 LB: > { %s1527_s16 = sadd.s32 4294967295, %s1478_s15   ;;  %s1215_s17 = sadd.s32 4294967294, %s1478_s15   ;;  %s1478_s15 = sphi %s1512_s15, %s1780_s15   ;;  %s1474_s14 = sphi %s1510_s14, %s1779_s14   ;;  %s1470_s13 = sphi %s1508_s13, %s1778_s13   ;;  %s1466_s12 = sphi %s1506_s12, %s1777_s12  }
   0x4   : > { %s1531_s18 = sadd.s32 1, %s1478_s15   ;;  %s91_s19 = sadd.s32 1, %s1474_s14 }
   0x5   : > { %s88_s20 = ssub.s32 %s1478_s15, %s1531_s18  ;;  %p101_p0 = scmp.ne.s32.totalorder %s1474_s14, %s1470_s13 }
   0x6   : > { %p89_p1 = scmp.eq.s32.totalorder %s88_s20, 0  ;;  %p102_p2 = scmp.eq.s32.totalorder %s1527_s16, 1 }
   0x7   : > { %p107_p3 = scmp.ne.s32.totalorder %s1470_s13, %s1466_s12  ;;  %p108_p4 = scmp.eq.s32.totalorder %s1215_s17, 1 }
   0x8   : > { %s1542_s21 = scalar_select %p89_p1, %s1474_s14, %s91_s19  }
   0x9   : > { %p1544_p5 = por %p102_p2, %p101_p0  ;;  %p1548_p6 = por %p108_p4, %p107_p3 }
   0xa   : > { %p1218_p7 = scmp.ge.s32.totalorder %s1478_s15, 1  ;;  %p140_p8 = scmp.lt.s32.totalorder %s1478_s15, 3 }
   0xc   : > { %p141_p9 = pnand %p1218_p7, %p140_p8 }
   0xd   : > { %p164_p10 = scmp.lt.s32.totalorder (!%p141_p9), %s1527_s16, 1  ;;  %s161_s29 = sand.u32 (!%p141_p9), 1, %s1470_s13  }
   0xe   : > { %144 = sbr.rel (%p141_p9) target bundleno = 292 (0x124), region = 32  ;;  %s1219_s30 = sshll.u32 (!%p141_p9), %s161_s29, 4 }
   0xf   : > { %s1276_s8 = sshll.u32 (!%p141_p9), %s1527_s16, 8  ;;  %s1483_s19 = smov (!%p141_p9), [#allocation2]  }
  0x10   : > { %s1719_s11 = scalar_lea.hbm (!%p141_p9), %s1770_s3, %s1276_s8  ;;  %s1422_s20 = sshll.u32 (!%p141_p9), %s1483_s19, 4  ;;  %s1423_s20 = int_to_ptr.vmem [resolvable:$false] %s1422_s20 }
  0x11   : > { %s1424_s24 = scalar_lea.vmem (!%p141_p9), %s1423_s20, 512 }
  0x13   : > { %v181_v0 = vld [vmem:[%s1768_s1 + $0x4] sm:$0xf]  ;;  %vm207_vm0 = vcmask 1043456   ;;  %v175_v1 = vld [vmem:[%s1768_s1] sm:$0xf]  ;;  %v191_v2 = vlaneseq  ;;  %v1480_v3 = vmov 0.0  }
  0x14   : > { %1295 = vmatprep.subr.bf16.mxu0 %v1480_v3  ;;  %1301 = vmatprep.subr.bf16.mxu1 %v1480_v3  ;;  %v209_v4 = vsel %vm207_vm0, %v181_v0, 0  ;;  %v277_v5 = vsel %vm207_vm0, %v175_v1, 0  ;;  %v1481_v6 = vmov 1983009808   ;;  %vm1482_vm1 = vmmov 0   ;;  %s165_s28 = scalar_select %p164_p10, %s1527_s16, 1 }
  0x15   : > { %1296 = vmatpush3.bf16.msra.mxu0 %v209_v4  ;;  %1302 = vmatpush3.bf16.msra.mxu1 %v277_v5  ;;  %v189_v7 = vunpack.c.l.s4 %v1481_v6  ;;  %v192_v8 = vshrl.u32 %v191_v2, 7  ;;  %v423_v9 = vld [vmem:[%s1768_s1 + $0x8] sm:$0xf]  ;;  %v495_v10 = vld [vmem:[%s1768_s1 + $0xc] sm:$0xf]  ;;  %vm203_vm2 = vcmask 64512  }
  0x16   : > { %1297 = vmatprep.mubr.msk.bf16.mxu0 %vm1482_vm1, %v1480_v3  ;;  %1303 = vmatprep.mubr.msk.bf16.mxu1 %vm1482_vm1, %v1480_v3  ;;  %s1349_s6 = smul.u32 80, %s165_s28  ;;  %v445_v12 = vsel %vm207_vm0, %v423_v9, 0  ;;  %v521_v13 = vsel %vm207_vm0, %v495_v10, 0  ;;  %vm360_vm3 = vsmask.f32 1280  ;;  %vm1134_vm10 = vcmask 60416  }
  0x17   : > { %v190_v11 = vunpack.c.0.s8 %v189_v7  ;;  %1307 = vmatprep.subr.bf16.mxu0 %v1480_v3  ;;  %1313 = vmatprep.subr.bf16.mxu1 %v1480_v3  ;;  %vm361_vm4 = vsmask.f32 3336  ;;  %vm363_vm5 = vsmask.f32 5392  ;;  %vm365_vm6 = vsmask.f32 7448 }
  0x18   : > { %s1583_s9 = scalar_lea.vmem %s1767_s0, %s1349_s6  ;;  %vm362_vm7 = vmor %vm360_vm3, %vm361_vm4  ;;  %v738_v52 = vld [vmem:[%s1768_s1 + $0x14] sm:$0xf]  ;;  %v571_v57 = vld [vmem:[%s1768_s1 + $0x10] sm:$0xf]  ;;  %s163_s6 = scalar_lea.vmem [#allocation2], %s1219_s30 }
  0x19   : > { %v1585_v14 = vsub.s32 %v190_v11, %v192_v8  ;;  %v1406_v15 = vld.sshfl [vmem:[%s1583_s9 + $0x14] sm:$0xf pattern:$0x76325410]  ;;  %vm1599_vm8 = vmor %vm362_vm7, %vm363_vm5  ;;  %v760_v7 = vsel %vm207_vm0, %v738_v52, 0  ;;  %v597_v11 = vsel %vm207_vm0, %v571_v57, 0 }
  0x1a   : > { %v1407_v16 = vld.sshfl [vmem:[%s1583_s9 + $0x1c] sm:$0xf pattern:$0x76325410]  ;;  %vm1611_vm9 = vmor %vm1599_vm8, %vm365_vm6  ;;  %s1153_s7 = sshll.u32 %s163_s6, 4  ;;  %s1727_s16 = scalar_lea.sflag [#allocation3], %s161_s29  ;;  %s1721_s7 = int_to_ptr.vmem [resolvable:$true] %s1153_s7 }
  0x1b   : > { %v1408_v17 = vld.sshfl [vmem:[%s1583_s9] sm:$0xf pattern:$0x76325410]  ;;  %v202_v20 = vcombine.low %v1406_v15, %v1407_v16  ;;  %s1418_s17 = scalar_lea.vmem %s1721_s7, 256  ;;  %p1425_p0 = scmp.lt.s32.totalorder %s1721_s7, %s1423_s20 }
  0x1c   : > { %v1409_v18 = vld.sshfl [vmem:[%s1583_s9 + $0x8] sm:$0xf pattern:$0x76325410]  ;;  %p1419_p11 = scmp.ne.s32.totalorder %s1721_s7, %s1418_s17  ;;  %p1426_p1 = scmp.lt.s32.totalorder %s1424_s24, %s1418_s17 }
  0x1d   : > { %v1227_v19 = vld.sshfl [vmem:[%s1583_s9] sm:$0x13 pattern:$0x76325410]  ;;  %1298 = vmatmul.mubr.msk.bf16.vlgmr.msra.gmra.mxu0 %vm203_vm2, %v202_v20  ;;  %v272_v27 = vcombine.low %v1408_v17, %v1409_v18 }
  0x1e   : > { %v1228_v21 = vld.sshfl [vmem:[%s1583_s9 + $0x4] sm:$0x13 pattern:$0x76325410]  ;;  %v335_v22 = vcombine.high %v1227_v19, %v1227_v19  ;;  %v368_v25 = vshrl.u32 %v1227_v19, 16  ;;  %v371_v26 = vshll.u32 %v1227_v19, 16  ;;  %1308 = vmatpush3.bf16.msra.mxu0 %v445_v12  ;;  %1309 = vmatprep.mubr.msk.bf16.mxu0 %vm1482_vm1, %v1480_v3  ;;  %p1420_p12 = pnand %p1419_p11, %p1544_p5  ;;  %p1427_p2 = por %p1426_p1, %p1425_p0 }
  0x1f   : > { %v1229_v23 = vld.sshfl [vmem:[%s1583_s9 + $0x8] sm:$0x13 pattern:$0x76325410]  ;;  %v343_v24 = vcombine.high %v1228_v21, %v1228_v21  ;;  %v382_v31 = vshrl.u32 %v1228_v21, 16  ;;  %v385_v36 = vshll.u32 %v1228_v21, 16  ;;  %1304 = vmatmul.mubr.msk.bf16.vlgmr.msra.gmra.mxu1 %vm203_vm2, %v272_v27  ;;  %1319 = vmatprep.subr.bf16.mxu0 %v1480_v3 }
  0x20   : > { %v1230_v28 = vld.sshfl [vmem:[%s1583_s9 + $0xc] sm:$0x13 pattern:$0x76325410]  ;;  %v351_v29 = vcombine.high %v1229_v23, %v1229_v23  ;;  %v377_v30 = vshll.u32 %v335_v22, 16  ;;  %v370_v34 = vrot.slane %v368_v25, 6  ;;  %1314 = vmatpush3.bf16.msra.mxu1 %v521_v13  ;;  %1315 = vmatprep.mubr.msk.bf16.mxu1 %vm1482_vm1, %v1480_v3  ;;  %p1421_p13 = pneg %p1420_p12 }
  0x21   : > { %v359_v32 = vcombine.high %v1230_v28, %v1230_v28  ;;  %v373_v35 = vrot.slane %v371_v26, 7  ;;  %v384_v38 = vrot.slane %v382_v31, 6  ;;  %v391_v39 = vshll.u32 %v343_v24, 16  ;;  %1325 = vmatprep.subr.bf16.mxu1 %v1480_v3 }
  0x22   : > { %v379_v37 = vrot.slane %v377_v30, 7  ;;  %v396_v40 = vshrl.u32 %v1229_v23, 16  ;;  %v387_v42 = vrot.slane %v385_v36, 7  ;;  %v399_v43 = vshll.u32 %v1229_v23, 16  ;;  %p1428_p3 = pnand %p1427_p2, %p1421_p13 }
  0x23   : > { %v374_v41 = vor.u32 %v373_v35, %v370_v34  ;;  %v405_v44 = vshll.u32 %v351_v29, 16  ;;  %v1410_v45 = vld.sshfl [vmem:[%s1583_s9 + $0x28] sm:$0xf pattern:$0x76325410]  ;;  %v393_v47 = vrot.slane %v391_v39, 7 }
  0x24   : > { %v398_v48 = vrot.slane %v396_v40, 6  ;;  %v410_v49 = vshrl.u32 %v1230_v28, 16  ;;  %v413_v50 = vshll.u32 %v1230_v28, 16  ;;  %v388_v54 = vor.u32 %v387_v42, %v384_v38 }
  0x25   : > { %v1411_v51 = vld.sshfl [vmem:[%s1583_s9 + $0x30] sm:$0xf pattern:$0x76325410]  ;;  %v375_v53 = vrot.slane %v374_v41, 2  ;;  %v401_v55 = vrot.slane %v399_v43, 7 }
  0x26   : > { %v407_v56 = vrot.slane %v405_v44, 7  ;;  %v412_v58 = vrot.slane %v410_v49, 6  ;;  %v415_v59 = vrot.slane %v413_v50, 7  ;;  %v419_v60 = vshll.u32 %v359_v32, 16 }
  0x27   : > { %v380_v61 = vsel %vm1611_vm9, %v375_v53, %v379_v37  ;;  %v389_v62 = vrot.slane %v388_v54, 2  ;;  %v402_v63 = vor.u32 %v401_v55, %v398_v48  ;;  %v1626_v2 = vld.sshfl [vmem:[%s1583_s9 + $0x3c] sm:$0xf pattern:$0x76325410]  ;;  %v516_v6 = vcombine.low %v1410_v45, %v1411_v51 }
  0x28   : > { %v416_v0 = vor.u32 %v415_v59, %v412_v58  ;;  %v421_v1 = vrot.slane %v419_v60, 7  ;;  %v1246_v8 = vld.sshfl [vmem:[%s1583_s9 + $0x28] sm:$0x13 pattern:$0x76325410] }
  0x29   : > { %v1630_v4 = vsel %vm1611_vm9, %v389_v62, %v393_v47  ;;  %v403_v5 = vrot.slane %v402_v63, 2  ;;  %v1247_v12 = vld.sshfl [vmem:[%s1583_s9 + $0x2c] sm:$0x13 pattern:$0x76325410]  ;;  %1316 = vmatmul.mubr.msk.bf16.vlgmr.msra.gmra.mxu1 %vm203_vm2, %v516_v6  ;;  %v657_v16 = vcombine.high %v1246_v8, %v1246_v8  ;;  %v683_v18 = vshrl.u32 %v1246_v8, 16 }
  0x2a   : > { %v417_v9 = vrot.slane %v416_v0, 2  ;;  %v424_v10 = vcombine.low %v380_v61, %v1630_v4  ;;  %v1248_v15 = vld.sshfl [vmem:[%s1583_s9 + $0x30] sm:$0x13 pattern:$0x76325410]  ;;  %v665_v17 = vcombine.high %v1247_v12, %v1247_v12  ;;  %1326 = vmatpush3.bf16.msra.mxu1 %v760_v7  ;;  %1327 = vmatprep.mubr.msk.bf16.mxu1 %vm1482_vm1, %v1480_v3  ;;  %v686_v22 = vshll.u32 %v1246_v8, 16 }
  0x2b   : > { %v1639_v13 = vsel %vm1611_vm9, %v403_v5, %v407_v56  ;;  %v1249_v21 = vld.sshfl [vmem:[%s1583_s9 + $0x34] sm:$0x13 pattern:$0x76325410]  ;;  %v673_v25 = vcombine.high %v1248_v15, %v1248_v15  ;;  %v685_v27 = vrot.slane %v683_v18, 6  ;;  %1337 = vmatprep.subr.bf16.mxu1 %v1480_v3  ;;  %v692_v29 = vshll.u32 %v657_v16, 16 }
  0x2c   : > { %v1645_v19 = vsel %vm1611_vm9, %v417_v9, %v421_v1  ;;  %v432_v20 = vrot.slane %v424_v10, %v1585_v14  ;;  %v1413_v24 = vld.sshfl [vmem:[%s1583_s9 + $0x44] sm:$0xf pattern:$0x76325410]  ;;  %v681_v26 = vcombine.high %v1249_v21, %v1249_v21  ;;  %v688_v28 = vrot.slane %v686_v22, 7 }
  0x2d   : > { %v425_v23 = vcombine.low %v1639_v13, %v1645_v19  ;;  %v697_v30 = vshrl.u32 %v1247_v12, 16  ;;  %v700_v31 = vshll.u32 %v1247_v12, 16  ;;  %v706_v33 = vshll.u32 %v665_v17, 16  ;;  %v810_v59 = vld [vmem:[%s1768_s1 + $0x18] sm:$0xf] }
  0x2e   : > { %v711_v34 = vshrl.u32 %v1248_v15, 16  ;;  %v714_v35 = vshll.u32 %v1248_v15, 16  ;;  %v689_v36 = vor.u32 %v688_v28, %v685_v27  ;;  %v694_v37 = vrot.slane %v692_v29, 7 }
  0x2f   : > { %v439_v32 = vrot.slane %v425_v23, %v1585_v14  ;;  %v699_v38 = vrot.slane %v697_v30, 6  ;;  %v702_v39 = vrot.slane %v700_v31, 7  ;;  %v708_v41 = vrot.slane %v706_v33, 7 }
  0x30   : > { %v713_v42 = vrot.slane %v711_v34, 6  ;;  %v716_v43 = vrot.slane %v714_v35, 7  ;;  %v690_v44 = vrot.slane %v689_v36, 2  ;;  %v720_v47 = vshll.u32 %v673_v25, 16 }
  0x31   : > { %v440_v40 = vcombine.low %v432_v20, %v439_v32  ;;  %v703_v45 = vor.u32 %v702_v39, %v699_v38  ;;  %v725_v48 = vshrl.u32 %v1249_v21, 16  ;;  %v728_v50 = vshll.u32 %v1249_v21, 16  ;;  %v1268_v60 = vld.sshfl [vmem:[%s1583_s9 + $0x10] sm:$0x13 pattern:$0x76325410] }
  0x32   : > { %v717_v49 = vor.u32 %v716_v43, %v713_v42  ;;  %v734_v51 = vshll.u32 %v681_v26, 16  ;;  %v695_v54 = vsel %vm1611_vm9, %v690_v44, %v694_v37  ;;  %v722_v56 = vrot.slane %v720_v47, 7  ;;  %v1414_v0 = vld.sshfl [vmem:[%s1583_s9 + $0x4] sm:$0xf pattern:$0x76325410] }
  0x33   : > { %1310 = vmatmul.mubr.msk.bf16.vlgmr.msra.gmra.mxu0 %vm203_vm2, %v440_v40  ;;  %v704_v52 = vrot.slane %v703_v45, 2  ;;  %v727_v53 = vrot.slane %v725_v48, 6  ;;  %v730_v57 = vrot.slane %v728_v50, 7  ;;  %v592_v61 = vcombine.low %v1626_v2, %v1413_v24  ;;  %v886_v20 = vld [vmem:[%s1768_s1 + $0x1c] sm:$0xf] }
  0x34   : > { %1320 = vmatpush3.bf16.msra.mxu0 %v597_v11  ;;  %1321 = vmatprep.mubr.msk.bf16.mxu0 %vm1482_vm1, %v1480_v3  ;;  %v718_v55 = vrot.slane %v717_v49, 2  ;;  %v736_v63 = vrot.slane %v734_v51, 7  ;;  %v1415_v5 = vld.sshfl [vmem:[%s1583_s9 + $0xc] sm:$0xf pattern:$0x76325410]  ;;  %v996_v6 = vcombine.high %v1268_v60, %v1268_v60  ;;  %v1054_v31 = vcombine.low %v1630_v4, %v1639_v13 }
  0x35   : > { %1331 = vmatprep.subr.bf16.mxu0 %v1480_v3  ;;  %v709_v58 = vsel %vm1611_vm9, %v704_v52, %v708_v41  ;;  %v731_v62 = vor.u32 %v730_v57, %v727_v53  ;;  %v1040_v7 = vshrl.u32 %v1268_v60, 16  ;;  %v836_v10 = vsel %vm207_vm0, %v810_v59, 0  ;;  %v1416_v24 = vld.sshfl [vmem:[%s1583_s9 + $0x18] sm:$0xf pattern:$0x76325410] }
  0x36   : > { %v739_v1 = vcombine.low %v695_v54, %v709_v58  ;;  %v723_v8 = vsel %vm1611_vm9, %v718_v55, %v722_v56  ;;  %v1043_v11 = vshll.u32 %v1268_v60, 16  ;;  %v1049_v15 = vshll.u32 %v996_v6, 16  ;;  %v1417_v25 = vld.sshfl [vmem:[%s1583_s9 + $0x20] sm:$0xf pattern:$0x76325410] }
  0x37   : > { %v732_v9 = vrot.slane %v731_v62, 2  ;;  %v1042_v12 = vrot.slane %v1040_v7, 6  ;;  %v1053_v26 = vld [vmem:[%s1768_s1 + $0x20] sm:$0xf]  ;;  %v912_v29 = vsel %vm207_vm0, %v886_v20, 0  ;;  %v831_v30 = vcombine.low %v1414_v0, %v1415_v5 }
  0x38   : > { %v1045_v16 = vrot.slane %v1043_v11, 7  ;;  %v747_v18 = vrot.slane %v739_v1, %v1585_v14  ;;  %v1051_v22 = vrot.slane %v1049_v15, 7  ;;  %v1075_v33 = vsel %vm207_vm0, %v1053_v26, 0 }
  0x39   : > { %v737_v2 = vsel %vm1611_vm9, %v732_v9, %v736_v63  ;;  %v1062_v35 = vrot.slane %v1054_v31, %v1585_v14  ;;  %v907_v46 = vcombine.low %v1416_v24, %v1417_v25 }
  0x3a   : > { %v740_v17 = vcombine.low %v723_v8, %v737_v2  ;;  %v1046_v21 = vor.u32 %v1045_v16, %v1042_v12 }
  0x3b   : > { %1322 = vmatmul.mubr.msk.bf16.vlgmr.msra.gmra.mxu0 %vm203_vm2, %v592_v61 }
  0x3c   : > { %1332 = vmatpush3.bf16.msra.mxu0 %v836_v10  ;;  %1333 = vmatprep.mubr.msk.bf16.mxu0 %vm1482_vm1, %v1480_v3  ;;  %v754_v23 = vrot.slane %v740_v17, %v1585_v14  ;;  %v1047_v27 = vrot.slane %v1046_v21, 2  ;;  %v1270_v17 = vld [vmem:[%s1769_s2] ss:$0 sm:$0xff] }
  0x3d   : > { %1343 = vmatprep.subr.bf16.mxu0 %v1480_v3 }
  0x3e   : > { %v755_v28 = vcombine.low %v747_v18, %v754_v23  ;;  %v1052_v32 = vsel %vm1611_vm9, %v1047_v27, %v1051_v22 }
  0x3f   : > { %v1055_v34 = vcombine.low %v1645_v19, %v1052_v32 }
  0x40   : > { %1328 = vmatmul.mubr.msk.bf16.vlgmr.msra.gmra.mxu1 %vm203_vm2, %v755_v28 }
  0x41   : > { %1338 = vmatpush3.bf16.msra.mxu1 %v912_v29  ;;  %1339 = vmatprep.mubr.msk.bf16.mxu1 %vm1482_vm1, %v1480_v3  ;;  %v1069_v36 = vrot.slane %v1055_v34, %v1585_v14 }
  0x43   : > { %1334 = vmatmul.mubr.msk.bf16.vlgmr.msra.gmra.mxu0 %vm203_vm2, %v831_v30  ;;  %v1070_v4 = vcombine.low %v1062_v35, %v1069_v36 }
  0x44   : > { %1344 = vmatpush3.bf16.msra.mxu0 %v1075_v33  ;;  %1345 = vmatprep.mubr.msk.bf16.mxu0 %vm1482_vm1, %v1480_v3 }
  0x48   : > { %1340 = vmatmul.mubr.msk.bf16.vlgmr.msra.gmra.mxu1 %vm203_vm2, %v907_v46 }
  0x4b   : > { %1346 = vmatmul.mubr.msk.bf16.vlgmr.msra.gmra.mxu0 %vm203_vm2, %v1070_v4 }
  0xdd   : > { %v245_v13 = vpop.f32.mrf.mxu0 }
  0xdf   : > { %v313_v19 = vpop.f32.mrf.mxu1  ;;  %v1299_v37 = vpop.f32.mrf.mxu0 }
  0xe0   : > { %v314_v49 = vadd.f32 %v313_v19, %v245_v13 }
  0xe1   : > { %v1305_v38 = vpop.f32.mrf.mxu1  ;;  %v248_v39 = vpop.f32.mrf.mxu0 }
  0xe3   : > { %v316_v40 = vpop.f32.mrf.mxu1  ;;  %v1300_v41 = vpop.f32.mrf.mxu0 }
  0xe4   : > { %v317_v53 = vadd.f32 %v316_v40, %v248_v39 }
  0xe5   : > { %v1306_v42 = vpop.f32.mrf.mxu1 }
  0xe9   : > { %v557_v43 = vpop.f32.mrf.mxu1 }
  0xeb   : > { %v1317_v14 = vpop.f32.mrf.mxu1 }
  0xed   : > { %v560_v44 = vpop.f32.mrf.mxu1 }
  0xef   : > { %v1318_v45 = vpop.f32.mrf.mxu1 }
  0xf3   : > { %v481_v47 = vpop.f32.mrf.mxu0 }
  0xf4   : > { %v488_v51 = vadd.f32 %v481_v47, %v314_v49 }
  0xf5   : > { %v1311_v3 = vpop.f32.mrf.mxu0 }
  0xf6   : > { %v564_v55 = vadd.f32 %v557_v43, %v488_v51 }
  0xf7   : > { %v484_v48 = vpop.f32.mrf.mxu0 }
  0xf8   : > { %v489_v56 = vadd.f32 %v484_v48, %v317_v53 }
  0xf9   : > { %v1312_v50 = vpop.f32.mrf.mxu0 }
  0xfa   : > { %v565_v61 = vadd.f32 %v560_v44, %v489_v56 }
  0xfb   : > { %v633_v52 = vpop.f32.mrf.mxu0 }
  0xfc   : > { %v640_v58 = vadd.f32 %v633_v52, %v564_v55 }
  0xfd   : > { %v1323_v54 = vpop.f32.mrf.mxu0 }
  0xff   : > { %v636_v57 = vpop.f32.mrf.mxu0 }
 0x100   : > { %v796_v60 = vpop.f32.mrf.mxu1  ;;  %v641_v1 = vadd.f32 %v636_v57, %v565_v61 }
 0x101   : > { %v1324_v59 = vpop.f32.mrf.mxu0  ;;  %v803_v0 = vadd.f32 %v796_v60, %v640_v58 }
 0x102   : > { %v1329_v62 = vpop.f32.mrf.mxu1 }
 0x103   : > { %v872_v63 = vpop.f32.mrf.mxu0 }
 0x104   : > { %v799_v5 = vpop.f32.mrf.mxu1  ;;  %v879_v7 = vadd.f32 %v872_v63, %v803_v0 }
 0x105   : > { %v1335_v6 = vpop.f32.mrf.mxu0  ;;  %v804_v10 = vadd.f32 %v799_v5, %v641_v1 }
 0x106   : > { %v1330_v8 = vpop.f32.mrf.mxu1 }
 0x107   : > { %v875_v9 = vpop.f32.mrf.mxu0 }
 0x108   : > { %v948_v11 = vpop.f32.mrf.mxu1  ;;  %v880_v2 = vadd.f32 %v875_v9, %v804_v10 }
 0x109   : > { %v1336_v12 = vpop.f32.mrf.mxu0  ;;  %v955_v15 = vadd.f32 %v948_v11, %v879_v7 }
 0x10a   : > { %v1341_v16 = vpop.f32.mrf.mxu1 }
 0x10b   : > { %v1111_v18 = vpop.f32.mrf.mxu0 }
 0x10c   : > { %v1118_v20 = vadd.f32 %v1111_v18, %v955_v15  ;;  %v951_v21 = vpop.f32.mrf.mxu1 }
 0x10d   : > { %v1347_v22 = vpop.f32.mrf.mxu0  ;;  %v956_v23 = vadd.f32 %v951_v21, %v880_v2 }
 0x10e   : > { %v1126_v24 = vadd.f32 %v1270_v17, %v1118_v20  ;;  %v1342_v25 = vpop.f32.mrf.mxu1 }
 0x10f   : > { %v1114_v26 = vpop.f32.mrf.mxu0 }
 0x110   : > { %v1130_v27 = vcombine.high %v1126_v24, %v1126_v24  ;;  %1135 = vst.msk [vmem:[%s163_s6] sm:$0xf] %vm1134_vm10, %v1126_v24  ;;  %v1119_v28 = vadd.f32 %v1114_v26, %v956_v23 }
 0x111   : > { %v1348_v29 = vpop.f32.mrf.mxu0 }
 0x112   : > { %1136 = vst.msk [vmem:[%s163_s6 + $0x4] sm:$0xf] %vm1134_vm10, %v1130_v27  ;;  %v1127_v30 = vadd.f32 %v1270_v17, %v1119_v28 }
 0x114   : > { %v1131_v31 = vcombine.high %v1127_v30, %v1127_v30  ;;  %1137 = vst.msk [vmem:[%s163_s6 + $0x8] sm:$0xf] %vm1134_vm10, %v1127_v30 }
 0x116   : > { %1138 = vst.msk [vmem:[%s163_s6 + $0xc] sm:$0xf] %vm1134_vm10, %v1131_v31 }
 0x117   : > { %1431 = shalt.err (!%p1428_p3)
}
 0x118   : > { %s1432_s25 = scalar_lea.hbm %s1719_s11, 256  ;;  %s1436_s28 = scalar_lea.hbm %s1770_s3, 512 }
 0x119   : > { %p1433_p4 = scmp.ne.s32.totalorder %s1719_s11, %s1432_s25  ;;  %p1437_p9 = scmp.lt.s32.totalorder %s1719_s11, %s1770_s3 }
 0x11a   : > { %p1438_p10 = scmp.lt.s32.totalorder %s1436_s28, %s1432_s25 }
 0x11b   : > { %p1434_p7 = pnand %p1433_p4, %p1544_p5 }
 0x11c   : > { %p1439_p11 = por %p1438_p10, %p1437_p9 }
 0x11d   : > { %p1435_p8 = pneg %p1434_p7 }
 0x11f   : > { %p1440_p12 = pnand %p1439_p11, %p1435_p8 }
 0x121   : > { %1443 = shalt.err (!%p1440_p12)
}
 0x122   : > { %s1484_s4 = smov 64   ;;  %s1485_s5 = smov 4  }
 0x123   : > { %1350 = dma.vmem_to_hbm [thread:$0]  (%p1544_p5), %s1721_s7, 256, %s1719_s11, %s1727_s16, %s1484_s4, %s1484_s4, %s1485_s5  }
 0x124 PF: > { %p1356_p13 = scmp.ge.s32.totalorder %s1478_s15, 2  ;;  %s1168_s6 = sand.u32 1, %s1466_s12  }
 0x125   : > { %s1169_s8 = scalar_lea.sflag [#allocation3], %s1168_s6 }
 0x126   : > { %p1353_p0 = pnand %p1356_p13, %p1548_p6 }
 0x128   : > { %p1354_p1 = pneg %p1353_p0 }
 0x12a   : > { %1461 = dma.done.wait (%p1354_p1), %s1169_s8, 256  }
 0x12b   : > { %1463 = vsyncadd (%p1354_p1), %s1169_s8, 4294967040  ;;  %p13_p2 = scmp.ge.s32.totalorder %s1531_s18, 4   ;;  %s1777_s12 = smov %s1470_s13 }
 0x12c   : > { %s1778_s13 = smov %s1474_s14  ;;  %s1779_s14 = smov %s1542_s21 }
 0x12d   : > { %s1780_s15 = smov %s1531_s18  ;;  %15 = sbr.rel (!%p13_p2) target bundleno = 3 (0x3), region = 72 }
 0x132   :  { %1174 = vsyncpa [#allocation3], 1 }
 0x133   :  { %1176 = vsyncpa [#allocation3 + $0x1], 1 }

// kernel: a_call__.2
= control target key start
LH: loop header
LB: loop body
LE: loop exit
PB: predicated region body
PF: predicated region fallthrough
CT: control target
= control target key end

     0   :  { %s2022_s12 = smov 0   ;;  %s2296_s0 = inlined_call_operand.vmem [shape: bf16[2,36,9,4], index: 0, kind: input, shape index: {}]   ;;  %s2297_s1 = inlined_call_operand.vmem [shape: bf16[36,8], index: 1, kind: input, shape index: {}]   ;;  %s2298_s2 = inlined_call_operand.vmem [shape: f32[1,8], index: 2, kind: input, shape index: {}]   ;;  %s2299_s3 = inlined_call_operand.vmem [shape: f32[2,8,8,8], index: 3, kind: output, shape index: {}]  }
   0x1 LB: > { %s1650_s13 = sadd.s32 4294967295, %s2000_s12   ;;  %p1654_p0 = scmp.ge.s32.totalorder %s2000_s12, 1  ;;  %s2000_s12 = sphi %s2022_s12, %s13_s12  }
   0x2   : > { %p137_p1 = scmp.lt.s32.totalorder %s2000_s12, 3 }
   0x4   : > { %p138_p2 = pnand %p1654_p0, %p137_p1 }
   0x5   : > { %p161_p3 = scmp.lt.s32.totalorder (!%p138_p2), %s1650_s13, 1 }
   0x6   : > { %141 = sbr.rel (%p138_p2) target bundleno = 297 (0x129), region = 32 }
   0xb   : > { %v1966_v0 = vld [vmem:[%s2297_s1] ss:$0 sps:$4 sm:$0xcc]   ;;  %vm229_vm0 = vcmask 1041408   ;;  %s2303_s13 = smov (!%p161_p3, %s1650_s13), 1  ;;  %vm216_vm1 = vcmask 31744  }
   0xc   : > { %v215_v1 = vrot.slane %v1966_v0, 2  ;;  %v181_v2 = vld [vmem:[%s2297_s1] sm:$0x3]  ;;  %v529_v3 = vld [vmem:[%s2297_s1 + $0x4] sm:$0x3]  ;;  %s1957_s22 = smul.u32 288, %s2303_s13 }
   0xd   : > { %v1972_v4 = vld [vmem:[%s2297_s1 + $0x4] ss:$0 sps:$4 sm:$0xcc]   ;;  %v331_v6 = vsel %vm229_vm0, %v181_v2, 0  ;;  %v555_v7 = vsel %vm229_vm0, %v529_v3, 0  ;;  %s1809_s9 = sshll.u32 %s2303_s13, 6 }
   0xe   : > { %1948 = vmatprep.subr.msk.bf16.mxu1 %vm229_vm0, %v215_v1  ;;  %1947 = vmatprep.subr.msk.bf16.mxu0 %vm229_vm0, %v215_v1  ;;  %v231_v5 = vsel %vm229_vm0, %v215_v1, 0  ;;  %s2053_s25 = scalar_lea.vmem %s2296_s0, %s1957_s22  ;;  %v663_v8 = vrot.slane %v1972_v4, 2  ;;  %v761_v10 = vld [vmem:[%s2297_s1 + $0x8] sm:$0x3]  ;;  %vm414_vm2 = vsmask.f32 3328  ;;  %s2273_s16 = scalar_lea.vmem %s2299_s3, %s1809_s9 }
   0xf   : > { %1946 = vmatpush3.bf16.msra.mxu1 %v231_v5  ;;  %1856 = vmatpush3.bf16.msra.mxu0 %v231_v5  ;;  %v1967_v9 = vld [vmem:[%s2053_s25 + $0x48] ss:$8 sps:$4 sm:$0xff]   ;;  %vm415_vm3 = vsmask.f32 7440  ;;  %v1969_v12 = vld [vmem:[%s2053_s25 + $0x58] ss:$8 sps:$4 sm:$0xff]  }
  0x10   : > { %1949 = vmatprep.subr.msk.bf16.mxu1 %vm229_vm0, %v181_v2  ;;  %1950 = vmatprep.subr.msk.bf16.mxu0 %vm229_vm0, %v529_v3  ;;  %v1968_v11 = vld [vmem:[%s2053_s25 + $0x68] ss:$8 sps:$4 sm:$0xff]   ;;  %v1970_v13 = vld [vmem:[%s2053_s25 + $0x78] ss:$8 sps:$4 sm:$0xff]   ;;  %v677_v15 = vsel %vm229_vm0, %v663_v8, 0  ;;  %v2071_v16 = vsel %vm229_vm0, %v761_v10, 0  ;;  %vm2087_vm4 = vmor %vm414_vm2, %vm415_vm3 }
  0x11   : > { %1857 = vmatprep.mubr.msk.bf16.mxu0 %vm216_vm1, %v1967_v9  ;;  %1861 = vmatprep.mubr.msk.bf16.mxu1 %vm216_vm1, %v1968_v11  ;;  %v1971_v14 = vld [vmem:[%s2053_s25] ss:$8 sps:$4 sm:$0xff]   ;;  %v399_v18 = vld [vmem:[%s2053_s25 + $0x4] sm:$0x1]  ;;  %v1973_v20 = vld [vmem:[%s2053_s25 + $0x10] ss:$8 sps:$4 sm:$0xff]  }
  0x12   : > { %1858 = vmatmul.mubr.msk.bf16.vlgmr.msra.gmra.mxu0 %vm216_vm1, %v1969_v12  ;;  %1862 = vmatmul.mubr.msk.bf16.vlgmr.msra.gmra.mxu1 %vm216_vm1, %v1970_v13  ;;  %v398_v17 = vld [vmem:[%s2053_s25] sm:$0xf]  ;;  %v400_v19 = vld [vmem:[%s2053_s25 + $0x8] sm:$0xf]  ;;  %v401_v21 = vld [vmem:[%s2053_s25 + $0xc] sm:$0x1] }
  0x13   : > { %1876 = vmatpush3.bf16.msra.mxu0 %v555_v7  ;;  %1866 = vmatpush3.bf16.msra.mxu1 %v331_v6  ;;  %v418_v22 = vshrl.u32 %v398_v17, 16  ;;  %v421_v23 = vshll.u32 %v398_v17, 16  ;;  %v427_v24 = vshll.u32 %v399_v18, 16  ;;  %v432_v25 = vshrl.u32 %v400_v19, 16  ;;  %v402_v28 = vld [vmem:[%s2053_s25 + $0x10] sm:$0xf] }
  0x14   : > { %1867 = vmatprep.mubr.msk.bf16.mxu1 %vm216_vm1, %v1971_v14  ;;  %1951 = vmatprep.subr.msk.bf16.mxu1 %vm229_vm0, %v663_v8  ;;  %v435_v26 = vshll.u32 %v400_v19, 16  ;;  %v441_v27 = vshll.u32 %v401_v21, 16  ;;  %v403_v29 = vld [vmem:[%s2053_s25 + $0x14] sm:$0x1]  ;;  %v404_v34 = vld [vmem:[%s2053_s25 + $0x18] sm:$0xf] }
  0x15   : > { %1952 = vmatprep.subr.msk.bf16.mxu0 %vm229_vm0, %v761_v10  ;;  %v420_v30 = vrot.slane %v418_v22, 4  ;;  %v423_v31 = vrot.slane %v421_v23, 5  ;;  %v429_v32 = vrot.slane %v427_v24, 5  ;;  %v434_v33 = vrot.slane %v432_v25, 4  ;;  %v405_v37 = vld [vmem:[%s2053_s25 + $0x1c] sm:$0x1] }
  0x16   : > { %v437_v35 = vrot.slane %v435_v26, 5  ;;  %v443_v36 = vrot.slane %v441_v27, 5  ;;  %v446_v38 = vshrl.u32 %v402_v28, 16  ;;  %v449_v39 = vshll.u32 %v402_v28, 16  ;;  %v1974_v53 = vld [vmem:[%s2053_s25 + $0x20] ss:$8 sps:$4 sm:$0xff]  }
  0x17   : > { %v424_v40 = vor.u32 %v423_v31, %v420_v30  ;;  %v455_v41 = vshll.u32 %v403_v29, 16  ;;  %v460_v42 = vshrl.u32 %v404_v34, 16  ;;  %v463_v43 = vshll.u32 %v404_v34, 16  ;;  %v1975_v59 = vld [vmem:[%s2053_s25 + $0x30] ss:$8 sps:$4 sm:$0xff]  }
  0x18   : > { %v438_v45 = vor.u32 %v437_v35, %v434_v33  ;;  %v448_v46 = vrot.slane %v446_v38, 4  ;;  %v451_v47 = vrot.slane %v449_v39, 5  ;;  %v469_v48 = vshll.u32 %v405_v37, 16  ;;  %v406_v60 = vld [vmem:[%s2053_s25 + $0x20] sm:$0xf] }
  0x19   : > { %v425_v49 = vrot.slane %v424_v40, 4  ;;  %v457_v50 = vrot.slane %v455_v41, 5  ;;  %v462_v51 = vrot.slane %v460_v42, 4  ;;  %v465_v52 = vrot.slane %v463_v43, 5  ;;  %v407_v61 = vld [vmem:[%s2053_s25 + $0x24] sm:$0x1] }
  0x1a   : > { %1868 = vmatmul.mubr.msk.bf16.vlgmr.msra.gmra.mxu1 %vm216_vm1, %v1973_v20  ;;  %v439_v54 = vrot.slane %v438_v45, 4  ;;  %v452_v55 = vor.u32 %v451_v47, %v448_v46  ;;  %v471_v56 = vrot.slane %v469_v48, 5  ;;  %v408_v0 = vld [vmem:[%s2053_s25 + $0x28] sm:$0xf]  ;;  %v409_v1 = vld [vmem:[%s2053_s25 + $0x2c] sm:$0x1] }
  0x1b   : > { %1886 = vmatpush3.bf16.msra.mxu1 %v677_v15  ;;  %v430_v57 = vsel %vm2087_vm4, %v425_v49, %v429_v32  ;;  %v466_v58 = vor.u32 %v465_v52, %v462_v51  ;;  %1871 = vmatprep.mubr.msk.bf16.mxu1 %vm216_vm1, %v1974_v53  ;;  %v474_v2 = vshrl.u32 %v406_v60, 16  ;;  %v477_v5 = vshll.u32 %v406_v60, 16  ;;  %v410_v7 = vld [vmem:[%s2053_s25 + $0x30] sm:$0xf]  ;;  %v411_v12 = vld [vmem:[%s2053_s25 + $0x34] sm:$0x1] }
  0x1c   : > { %v444_v62 = vsel %vm2087_vm4, %v439_v54, %v443_v36  ;;  %v453_v63 = vrot.slane %v452_v55, 4  ;;  %v483_v6 = vshll.u32 %v407_v61, 16  ;;  %v488_v10 = vshrl.u32 %v408_v0, 16  ;;  %v1977_v13 = vld [vmem:[%s2297_s1 + $0x8] ss:$0 sps:$4 sm:$0xcc]  }
  0x1d   : > { %v1683_v3 = vcombine.low %v430_v57, %v444_v62  ;;  %v467_v4 = vrot.slane %v466_v58, 4  ;;  %v476_v9 = vrot.slane %v474_v2, 4  ;;  %v491_v11 = vshll.u32 %v408_v0, 16  ;;  %v412_v19 = vld [vmem:[%s2053_s25 + $0x38] sm:$0xf] }
  0x1e   : > { %v458_v8 = vsel %vm2087_vm4, %v453_v63, %v457_v50  ;;  %v479_v15 = vrot.slane %v477_v5, 5  ;;  %v485_v17 = vrot.slane %v483_v6, 5  ;;  %v497_v18 = vshll.u32 %v409_v1, 16  ;;  %v1112_v20 = vld [vmem:[%s2297_s1 + $0xc] sm:$0x3] }
  0x1f   : > { %1877 = vmatprep.mubr.msk.bf16.mxu0 %vm216_vm1, %v1683_v3  ;;  %v472_v14 = vsel %vm2087_vm4, %v467_v4, %v471_v56  ;;  %v490_v22 = vrot.slane %v488_v10, 4  ;;  %v493_v23 = vrot.slane %v491_v11, 5  ;;  %v413_v24 = vld [vmem:[%s2053_s25 + $0x3c] sm:$0x1]  ;;  %v502_v25 = vshrl.u32 %v410_v7, 16 }
  0x20   : > { %v1684_v21 = vcombine.low %v458_v8, %v472_v14  ;;  %v480_v26 = vor.u32 %v479_v15, %v476_v9  ;;  %v499_v27 = vrot.slane %v497_v18, 5  ;;  %v505_v28 = vshll.u32 %v410_v7, 16  ;;  %v1976_v37 = vld [vmem:[%s2053_s25 + $0x90] ss:$8 sps:$4 sm:$0xff]   ;;  %v1725_v61 = vld [vmem:[%s2053_s25 + $0x94] sm:$0x1] }
  0x21   : > { %v511_v29 = vshll.u32 %v411_v12, 16  ;;  %v494_v30 = vor.u32 %v493_v23, %v490_v22  ;;  %v504_v31 = vrot.slane %v502_v25, 4  ;;  %v516_v32 = vshrl.u32 %v412_v19, 16  ;;  %v1981_v54 = vld [vmem:[%s2053_s25 + $0xb0] ss:$8 sps:$4 sm:$0xff]  }
  0x22   : > { %1872 = vmatmul.mubr.msk.bf16.gmra.mxu1 %vm216_vm1, %v1975_v59  ;;  %1878 = vmatmul.mubr.msk.bf16.vlgmr.msra.gmra.mxu0 %vm216_vm1, %v1684_v21  ;;  %v519_v33 = vshll.u32 %v412_v19, 16  ;;  %v481_v34 = vrot.slane %v480_v26, 4  ;;  %v507_v35 = vrot.slane %v505_v28, 5  ;;  %v525_v36 = vshll.u32 %v413_v24, 16  ;;  %v1979_v56 = vld [vmem:[%s2053_s25 + $0xd8] ss:$8 sps:$4 sm:$0xff]  }
  0x23   : > { %1896 = vmatpush3.bf16.msra.mxu0 %v2071_v16  ;;  %v495_v38 = vrot.slane %v494_v30, 4  ;;  %v518_v39 = vrot.slane %v516_v32, 4  ;;  %v1014_v41 = vrot.slane %v1977_v13, 2  ;;  %v513_v45 = vrot.slane %v511_v29, 5  ;;  %1887 = vmatprep.mubr.msk.bf16.mxu1 %vm216_vm1, %v1976_v37  ;;  %v1978_v16 = vld [vmem:[%s2053_s25 + $0xa0] ss:$8 sps:$4 sm:$0xff]  }
  0x24   : > { %v521_v40 = vrot.slane %v519_v33, 5  ;;  %1954 = vmatprep.subr.msk.bf16.mxu0 %vm229_vm0, %v1112_v20  ;;  %v486_v42 = vsel %vm2087_vm4, %v481_v34, %v485_v17  ;;  %v508_v43 = vor.u32 %v507_v35, %v504_v31  ;;  %v527_v48 = vrot.slane %v525_v36, 5  ;;  %v1982_v59 = vld [vmem:[%s2053_s25 + $0xc0] ss:$8 sps:$4 sm:$0xff]   ;;  %v1724_v60 = vld [vmem:[%s2053_s25 + $0x90] sm:$0xf] }
  0x25   : > { %v500_v46 = vsel %vm2087_vm4, %v495_v38, %v499_v27  ;;  %1953 = vmatprep.subr.msk.bf16.mxu1 %vm229_vm0, %v1014_v41  ;;  %v1028_v51 = vsel %vm229_vm0, %v1014_v41, 0  ;;  %v1146_v58 = vsel %vm229_vm0, %v1112_v20, 0  ;;  %v1726_v62 = vld [vmem:[%s2053_s25 + $0x98] sm:$0xf]  ;;  %v1727_v63 = vld [vmem:[%s2053_s25 + $0x9c] sm:$0x1] }
  0x26   : > { %v522_v47 = vor.u32 %v521_v40, %v518_v39  ;;  %v1685_v49 = vcombine.low %v486_v42, %v500_v46  ;;  %v509_v50 = vrot.slane %v508_v43, 4  ;;  %v887_v0 = vshrl.u32 %v1724_v60, 16  ;;  %v1728_v4 = vld [vmem:[%s2053_s25 + $0xa0] sm:$0xf]  ;;  %v1980_v5 = vld [vmem:[%s2053_s25 + $0xe8] ss:$8 sps:$4 sm:$0xff]  }
  0x27   : > { %v890_v1 = vshll.u32 %v1724_v60, 16  ;;  %v896_v2 = vshll.u32 %v1725_v61, 16  ;;  %v901_v3 = vshrl.u32 %v1726_v62, 16  ;;  %v904_v6 = vshll.u32 %v1726_v62, 16  ;;  %v1983_v10 = vld [vmem:[%s2053_s25 + $0xf8] ss:$8 sps:$4 sm:$0xff]  }
  0x28   : > { %v523_v52 = vrot.slane %v522_v47, 4  ;;  %1881 = vmatprep.mubr.msk.bf16.mxu0 %vm216_vm1, %v1685_v49  ;;  %v514_v53 = vsel %vm2087_vm4, %v509_v50, %v513_v45  ;;  %v910_v7 = vshll.u32 %v1727_v63, 16  ;;  %v1985_v8 = vld [vmem:[%s2297_s1 + $0xc] ss:$0 sps:$4 sm:$0xcc]   ;;  %v915_v9 = vshrl.u32 %v1728_v4, 16 }
  0x29   : > { %v889_v11 = vrot.slane %v887_v0, 4  ;;  %v892_v12 = vrot.slane %v890_v1, 5  ;;  %v898_v13 = vrot.slane %v896_v2, 5  ;;  %v903_v14 = vrot.slane %v901_v3, 4  ;;  %v1729_v15 = vld [vmem:[%s2053_s25 + $0xa4] sm:$0x1] }
  0x2a   : > { %1888 = vmatmul.mubr.msk.bf16.vlgmr.msra.gmra.mxu1 %vm216_vm1, %v1978_v16  ;;  %v528_v55 = vsel %vm2087_vm4, %v523_v52, %v527_v48  ;;  %v906_v17 = vrot.slane %v904_v6, 5  ;;  %v912_v18 = vrot.slane %v910_v7, 5  ;;  %v1254_v19 = vrot.slane %v1985_v8, 2  ;;  %v1730_v20 = vld [vmem:[%s2053_s25 + $0xa8] sm:$0xf] }
  0x2b   : > { %1906 = vmatpush3.bf16.msra.mxu1 %v1028_v51  ;;  %v1686_v57 = vcombine.low %v514_v53, %v528_v55  ;;  %1891 = vmatprep.mubr.msk.bf16.mxu1 %vm216_vm1, %v1981_v54  ;;  %v917_v21 = vrot.slane %v915_v9, 4  ;;  %v893_v22 = vor.u32 %v892_v12, %v889_v11  ;;  %v1731_v23 = vld [vmem:[%s2053_s25 + $0xac] sm:$0x1]  ;;  %v918_v24 = vshll.u32 %v1728_v4, 16  ;;  %v2162_v33 = vld [vmem:[%s2297_s1 + $0x10] sm:$0x3] }
  0x2c   : > { %v924_v25 = vshll.u32 %v1729_v15, 16  ;;  %v929_v26 = vshrl.u32 %v1730_v20, 16  ;;  %v907_v27 = vor.u32 %v906_v17, %v903_v14  ;;  %1955 = vmatprep.subr.msk.bf16.mxu1 %vm229_vm0, %v1254_v19  ;;  %v932_v28 = vshll.u32 %v1730_v20, 16  ;;  %v1732_v41 = vld [vmem:[%s2053_s25 + $0xb0] sm:$0xf] }
  0x2d   : > { %1882 = vmatmul.mubr.msk.bf16.gmra.mxu0 %vm216_vm1, %v1686_v57  ;;  %v938_v29 = vshll.u32 %v1731_v23, 16  ;;  %v894_v30 = vrot.slane %v893_v22, 4  ;;  %v920_v31 = vrot.slane %v918_v24, 5  ;;  %v1268_v40 = vsel %vm229_vm0, %v1254_v19, 0  ;;  %v1984_v42 = vld [vmem:[%s2053_s25 + $0x108] ss:$8 sps:$4 sm:$0xff]  }
  0x2e   : > { %1897 = vmatprep.mubr.msk.bf16.mxu0 %vm216_vm1, %v1979_v56  ;;  %v931_v32 = vrot.slane %v929_v26, 4  ;;  %v908_v34 = vrot.slane %v907_v27, 4  ;;  %v926_v35 = vrot.slane %v924_v25, 5  ;;  %v934_v36 = vrot.slane %v932_v28, 5  ;;  %v1733_v16 = vld [vmem:[%s2053_s25 + $0xb4] sm:$0x1] }
  0x2f   : > { %v899_v37 = vsel %vm2087_vm4, %v894_v30, %v898_v13  ;;  %v921_v38 = vor.u32 %v920_v31, %v917_v21  ;;  %v940_v39 = vrot.slane %v938_v29, 5  ;;  %v1734_v46 = vld [vmem:[%s2053_s25 + $0xb8] sm:$0xf]  ;;  %v1735_v47 = vld [vmem:[%s2053_s25 + $0xbc] sm:$0x1]  ;;  %v943_v51 = vshrl.u32 %v1732_v41, 16 }
  0x30   : > { %v913_v43 = vsel %vm2087_vm4, %v908_v34, %v912_v18  ;;  %v935_v45 = vor.u32 %v934_v36, %v931_v32  ;;  %v1986_v50 = vld [vmem:[%s2053_s25 + $0x8] ss:$8 sps:$4 sm:$0xff]   ;;  %v946_v52 = vshll.u32 %v1732_v41, 16  ;;  %v1736_v53 = vld [vmem:[%s2053_s25 + $0xc0] sm:$0xf]  ;;  %v952_v55 = vshll.u32 %v1733_v16, 16 }
  0x31   : > { %v1740_v48 = vcombine.low %v899_v37, %v913_v43  ;;  %v922_v49 = vrot.slane %v921_v38, 4  ;;  %v957_v56 = vshrl.u32 %v1734_v46, 16  ;;  %v960_v57 = vshll.u32 %v1734_v46, 16  ;;  %v1738_v63 = vld [vmem:[%s2053_s25 + $0xc8] sm:$0xf] }
  0x32   : > { %1892 = vmatmul.mubr.msk.bf16.gmra.mxu1 %vm216_vm1, %v1982_v59  ;;  %v936_v54 = vrot.slane %v935_v45, 4  ;;  %v945_v60 = vrot.slane %v943_v51, 4  ;;  %v948_v61 = vrot.slane %v946_v52, 5  ;;  %v966_v62 = vshll.u32 %v1735_v47, 16  ;;  %v1739_v4 = vld [vmem:[%s2053_s25 + $0xcc] sm:$0x1] }
  0x33   : > { %1907 = vmatprep.mubr.msk.bf16.mxu1 %vm216_vm1, %v1740_v48  ;;  %v927_v59 = vsel %vm2087_vm4, %v922_v49, %v926_v35  ;;  %v954_v1 = vrot.slane %v952_v55, 5  ;;  %v959_v2 = vrot.slane %v957_v56, 4  ;;  %v962_v3 = vrot.slane %v960_v57, 5  ;;  %v1987_v18 = vld [vmem:[%s2053_s25 + $0x18] ss:$8 sps:$4 sm:$0xff]  }
  0x34   : > { %v941_v0 = vsel %vm2087_vm4, %v936_v54, %v940_v39  ;;  %v949_v6 = vor.u32 %v948_v61, %v945_v60  ;;  %v968_v7 = vrot.slane %v966_v62, 5  ;;  %v971_v8 = vshrl.u32 %v1736_v53, 16  ;;  %v1988_v24 = vld [vmem:[%s2053_s25 + $0x28] ss:$8 sps:$4 sm:$0xff]   ;;  %v1783_v35 = vld [vmem:[%s2053_s25 + $0xc] sm:$0x1] }
  0x35   : > { %1898 = vmatmul.mubr.msk.bf16.vlgmr.msra.gmra.mxu0 %vm216_vm1, %v1980_v5  ;;  %v1741_v5 = vcombine.low %v927_v59, %v941_v0  ;;  %v963_v9 = vor.u32 %v962_v3, %v959_v2  ;;  %v985_v12 = vshrl.u32 %v1738_v63, 16  ;;  %v988_v15 = vshll.u32 %v1738_v63, 16  ;;  %v1782_v32 = vld [vmem:[%s2053_s25 + $0x8] sm:$0xf]  ;;  %v1784_v36 = vld [vmem:[%s2053_s25 + $0x10] sm:$0xf] }
  0x36   : > { %1916 = vmatpush3.bf16.msra.mxu0 %v1146_v58  ;;  %1901 = vmatprep.mubr.msk.bf16.mxu0 %vm216_vm1, %v1983_v10  ;;  %v1737_v58 = vld [vmem:[%s2053_s25 + $0xc4] sm:$0x1]  ;;  %v974_v10 = vshll.u32 %v1736_v53, 16  ;;  %v950_v13 = vrot.slane %v949_v6, 4  ;;  %v973_v14 = vrot.slane %v971_v8, 4  ;;  %v994_v17 = vshll.u32 %v1739_v4, 16 }
  0x37   : > { %1956 = vmatprep.subr.msk.bf16.mxu0 %vm229_vm0, %v2162_v33  ;;  %v980_v11 = vshll.u32 %v1737_v58, 16  ;;  %v964_v19 = vrot.slane %v963_v9, 4  ;;  %v987_v21 = vrot.slane %v985_v12, 4  ;;  %v990_v23 = vrot.slane %v988_v15, 5  ;;  %v1990_v39 = vld [vmem:[%s2053_s25 + $0x50] ss:$8 sps:$4 sm:$0xff]  }
  0x38   : > { %v976_v20 = vrot.slane %v974_v10, 5  ;;  %v955_v22 = vsel %vm2087_vm4, %v950_v13, %v954_v1  ;;  %v1497_v28 = vsel %vm229_vm0, %v2162_v33, 0  ;;  %v996_v31 = vrot.slane %v994_v17, 5  ;;  %v1786_v47 = vld [vmem:[%s2053_s25 + $0x18] sm:$0xf] }
  0x39   : > { %v969_v25 = vsel %vm2087_vm4, %v964_v19, %v968_v7  ;;  %v982_v27 = vrot.slane %v980_v11, 5  ;;  %v991_v30 = vor.u32 %v990_v23, %v987_v21  ;;  %v1360_v37 = vshrl.u32 %v1782_v32, 16  ;;  %v1787_v52 = vld [vmem:[%s2053_s25 + $0x1c] sm:$0x1]  ;;  %v1989_v54 = vld [vmem:[%s2053_s25 + $0x38] ss:$8 sps:$4 sm:$0xff]  }
  0x3a   : > { %1908 = vmatmul.mubr.msk.bf16.vlgmr.msra.gmra.mxu1 %vm216_vm1, %v1741_v5  ;;  %v977_v26 = vor.u32 %v976_v20, %v973_v14  ;;  %v1742_v29 = vcombine.low %v955_v22, %v969_v25  ;;  %v1363_v41 = vshll.u32 %v1782_v32, 16  ;;  %v1374_v43 = vshrl.u32 %v1784_v36, 16  ;;  %v1788_v57 = vld [vmem:[%s2053_s25 + $0x20] sm:$0xf]  ;;  %v1789_v58 = vld [vmem:[%s2053_s25 + $0x24] sm:$0x1] }
  0x3b   : > { %1926 = vmatpush3.bf16.msra.mxu1 %v1268_v40  ;;  %v992_v38 = vrot.slane %v991_v30, 4  ;;  %v1785_v40 = vld [vmem:[%s2053_s25 + $0x14] sm:$0x1]  ;;  %v1362_v45 = vrot.slane %v1360_v37, 4  ;;  %v1377_v16 = vshll.u32 %v1784_v36, 16  ;;  %v1388_v60 = vshrl.u32 %v1786_v47, 16 }
  0x3c   : > { %v978_v34 = vrot.slane %v977_v26, 4  ;;  %1911 = vmatprep.mubr.msk.bf16.mxu1 %vm216_vm1, %v1742_v29  ;;  %v1383_v46 = vshll.u32 %v1785_v40, 16  ;;  %v1365_v49 = vrot.slane %v1363_v41, 5  ;;  %v1376_v51 = vrot.slane %v1374_v43, 4  ;;  %v1991_v6 = vld [vmem:[%s2053_s25 + $0x60] ss:$8 sps:$4 sm:$0xff]  }
  0x3d   : > { %1902 = vmatmul.mubr.msk.bf16.gmra.mxu0 %vm216_vm1, %v1984_v42  ;;  %v1369_v42 = vshll.u32 %v1783_v35, 16  ;;  %v997_v48 = vsel %vm2087_vm4, %v992_v38, %v996_v31  ;;  %v1379_v55 = vrot.slane %v1377_v16, 5  ;;  %v1391_v61 = vshll.u32 %v1786_v47, 16  ;;  %v1992_v14 = vld [vmem:[%s2053_s25 + $0x70] ss:$8 sps:$4 sm:$0xff]  }
  0x3e   : > { %1917 = vmatprep.mubr.msk.bf16.mxu0 %vm216_vm1, %v1986_v50  ;;  %v983_v33 = vsel %vm2087_vm4, %v978_v34, %v982_v27  ;;  %v1385_v56 = vrot.slane %v1383_v46, 5  ;;  %v1366_v59 = vor.u32 %v1365_v49, %v1362_v45  ;;  %v1397_v62 = vshll.u32 %v1787_v52, 16  ;;  %v1790_v15 = vld [vmem:[%s2053_s25 + $0x28] sm:$0xf]  ;;  %v1791_v19 = vld [vmem:[%s2053_s25 + $0x2c] sm:$0x1] }
  0x3f   : > { %v1371_v50 = vrot.slane %v1369_v42, 5  ;;  %v1743_v53 = vcombine.low %v983_v33, %v997_v48  ;;  %v1380_v63 = vor.u32 %v1379_v55, %v1376_v51  ;;  %v1402_v0 = vshrl.u32 %v1788_v57, 16  ;;  %v1792_v20 = vld [vmem:[%s2053_s25 + $0x30] sm:$0xf]  ;;  %v1793_v21 = vld [vmem:[%s2053_s25 + $0x34] sm:$0x1] }
  0x40   : > { %v1405_v1 = vshll.u32 %v1788_v57, 16  ;;  %v1411_v2 = vshll.u32 %v1789_v58, 16  ;;  %v1367_v3 = vrot.slane %v1366_v59, 4  ;;  %v1390_v4 = vrot.slane %v1388_v60, 4  ;;  %v1794_v26 = vld [vmem:[%s2053_s25 + $0x38] sm:$0xf] }
  0x41   : > { %v1393_v5 = vrot.slane %v1391_v61, 5  ;;  %v1381_v7 = vrot.slane %v1380_v63, 4  ;;  %v1404_v8 = vrot.slane %v1402_v0, 4  ;;  %v1399_v12 = vrot.slane %v1397_v62, 5  ;;  %v1795_v31 = vld [vmem:[%s2053_s25 + $0x3c] sm:$0x1] }
  0x42   : > { %1912 = vmatmul.mubr.msk.bf16.gmra.mxu1 %vm216_vm1, %v1743_v53  ;;  %v1407_v9 = vrot.slane %v1405_v1, 5  ;;  %v1372_v10 = vsel %vm2087_vm4, %v1367_v3, %v1371_v50  ;;  %v1413_v13 = vrot.slane %v1411_v2, 5  ;;  %v1419_v25 = vshll.u32 %v1790_v15, 16  ;;  %v1796_v37 = vld [vmem:[%s2053_s25 + $0x40] sm:$0xf] }
  0x43   : > { %1927 = vmatprep.mubr.msk.bf16.mxu1 %vm216_vm1, %v1990_v39  ;;  %v1394_v11 = vor.u32 %v1393_v5, %v1390_v4  ;;  %v1386_v17 = vsel %vm2087_vm4, %v1381_v7, %v1385_v56  ;;  %v1430_v29 = vshrl.u32 %v1792_v20, 16  ;;  %v1433_v30 = vshll.u32 %v1792_v20, 16  ;;  %v1797_v42 = vld [vmem:[%s2053_s25 + $0x44] sm:$0x1] }
  0x44   : > { %v1798_v22 = vcombine.low %v1372_v10, %v1386_v17  ;;  %v1421_v35 = vrot.slane %v1419_v25, 5  ;;  %v1439_v36 = vshll.u32 %v1793_v21, 16  ;;  %v1444_v16 = vshrl.u32 %v1794_v26, 16 }
  0x45   : > { %1918 = vmatmul.mubr.msk.bf16.vlgmr.msra.gmra.mxu0 %vm216_vm1, %v1987_v18  ;;  %v1408_v18 = vor.u32 %v1407_v9, %v1404_v8  ;;  %v1395_v23 = vrot.slane %v1394_v11, 4  ;;  %v1432_v40 = vrot.slane %v1430_v29, 4  ;;  %v1435_v41 = vrot.slane %v1433_v30, 5 }
  0x46   : > { %1936 = vmatpush3.bf16.msra.mxu0 %v1497_v28  ;;  %1921 = vmatprep.mubr.msk.bf16.mxu0 %vm216_vm1, %v1988_v24  ;;  %v1416_v24 = vshrl.u32 %v1790_v15, 16  ;;  %v1425_v28 = vshll.u32 %v1791_v19, 16  ;;  %v1441_v45 = vrot.slane %v1439_v36, 5  ;;  %v1447_v47 = vshll.u32 %v1794_v26, 16 }
  0x47   : > { %v1409_v27 = vrot.slane %v1408_v18, 4  ;;  %v1400_v32 = vsel %vm2087_vm4, %v1395_v23, %v1399_v12  ;;  %v1436_v46 = vor.u32 %v1435_v41, %v1432_v40  ;;  %v1453_v48 = vshll.u32 %v1795_v31, 16 }
  0x48   : > { %v1418_v34 = vrot.slane %v1416_v24, 4  ;;  %v1427_v39 = vrot.slane %v1425_v28, 5  ;;  %v1458_v49 = vshrl.u32 %v1796_v37, 16  ;;  %v1446_v51 = vrot.slane %v1444_v16, 4 }
  0x49   : > { %v1414_v38 = vsel %vm2087_vm4, %v1409_v27, %v1413_v13  ;;  %v1461_v52 = vshll.u32 %v1796_v37, 16  ;;  %v1467_v53 = vshll.u32 %v1797_v42, 16  ;;  %v1437_v55 = vrot.slane %v1436_v46, 4 }
  0x4a   : > { %1928 = vmatmul.mubr.msk.bf16.vlgmr.msra.gmra.mxu1 %vm216_vm1, %v1991_v6  ;;  %v1799_v43 = vcombine.low %v1400_v32, %v1414_v38  ;;  %v1422_v33 = vor.u32 %v1421_v35, %v1418_v34  ;;  %v1449_v56 = vrot.slane %v1447_v47, 5  ;;  %v1460_v57 = vrot.slane %v1458_v49, 4 }
  0x4b   : > { %1931 = vmatprep.mubr.msk.bf16.mxu1 %vm216_vm1, %v1992_v14  ;;  %v1463_v59 = vrot.slane %v1461_v52, 5  ;;  %v1442_v60 = vsel %vm2087_vm4, %v1437_v55, %v1441_v45  ;;  %v1455_v62 = vrot.slane %v1453_v48, 5  ;;  %v1469_v1 = vrot.slane %v1467_v53, 5 }
  0x4c   : > { %v1423_v50 = vrot.slane %v1422_v33, 4  ;;  %v1450_v61 = vor.u32 %v1449_v56, %v1446_v51  ;;  %vm1586_vm5 = vcmask 64512  }
  0x4d   : > { %1922 = vmatmul.mubr.msk.bf16.gmra.mxu0 %vm216_vm1, %v1989_v54  ;;  %v1993_v54 = vld [vmem:[%s2053_s25 + $0x80] ss:$8 sps:$4 sm:$0xff]   ;;  %v1464_v0 = vor.u32 %v1463_v59, %v1460_v57 }
  0x4e   : > { %1937 = vmatprep.mubr.msk.bf16.mxu0 %vm216_vm1, %v1798_v22  ;;  %v1428_v58 = vsel %vm2087_vm4, %v1423_v50, %v1427_v39  ;;  %v1451_v2 = vrot.slane %v1450_v61, 4 }
  0x4f   : > { %v1800_v63 = vcombine.low %v1428_v58, %v1442_v60  ;;  %v1465_v3 = vrot.slane %v1464_v0, 4 }
  0x50   : > { %v1456_v4 = vsel %vm2087_vm4, %v1451_v2, %v1455_v62 }
  0x51   : > { %v1470_v5 = vsel %vm2087_vm4, %v1465_v3, %v1469_v1 }
  0x52   : > { %1932 = vmatmul.mubr.msk.bf16.gmra.mxu1 %vm216_vm1, %v1993_v54  ;;  %v1801_v6 = vcombine.low %v1456_v4, %v1470_v5 }
  0x55   : > { %1938 = vmatmul.mubr.msk.bf16.vlgmr.msra.gmra.mxu0 %vm216_vm1, %v1799_v43 }
  0x56   : > { %1941 = vmatprep.mubr.msk.bf16.mxu0 %vm216_vm1, %v1800_v63 }
  0x5d   : > { %1942 = vmatmul.mubr.msk.bf16.gmra.mxu0 %vm216_vm1, %v1801_v6 }
  0xd2   : > { %v1863_v7 = vpop.f32.mrf.mxu1  ;;  %v1859_v9 = vpop.f32.mrf.mxu0 }
  0xd4   : > { %v283_v8 = vpop.f32.mrf.mxu1  ;;  %v267_v12 = vpop.f32.mrf.mxu0 }
  0xd6   : > { %v2253_v10 = vpop.f32.mrf.mxu1  ;;  %v1860_v15 = vpop.f32.mrf.mxu0 }
  0xd8   : > { %v2255_v11 = vpop.f32.mrf.mxu1  ;;  %v270_v19 = vpop.f32.mrf.mxu0 }
  0xda   : > { %v1869_v13 = vpop.f32.mrf.mxu1 }
  0xdb   : > { %v376_v46 = vadd.f32 %v1869_v13, %v1859_v9 }
  0xdc   : > { %v367_v14 = vpop.f32.mrf.mxu1 }
  0xdd   : > { %v368_v49 = vadd.f32 %v367_v14, %v267_v12 }
  0xde   : > { %v1870_v17 = vpop.f32.mrf.mxu1 }
  0xdf   : > { %v379_v53 = vadd.f32 %v1870_v17, %v1860_v15 }
  0xe0   : > { %v370_v18 = vpop.f32.mrf.mxu1 }
  0xe1   : > { %v371_v57 = vadd.f32 %v370_v18, %v270_v19 }
  0xe2   : > { %v1873_v20 = vpop.f32.mrf.mxu1  ;;  %v1879_v44 = vpop.f32.mrf.mxu0 }
  0xe3   : > { %v624_v52 = vadd.f32 %v1879_v44, %v376_v46  ;;  %v392_v1 = vadd.f32 %v1873_v20, %v1863_v7 }
  0xe4   : > { %v383_v21 = vpop.f32.mrf.mxu1  ;;  %v591_v22 = vpop.f32.mrf.mxu0 }
  0xe5   : > { %v622_v56 = vadd.f32 %v591_v22, %v368_v49  ;;  %v384_v4 = vadd.f32 %v383_v21, %v283_v8 }
  0xe6   : > { %v1874_v23 = vpop.f32.mrf.mxu1  ;;  %v1880_v24 = vpop.f32.mrf.mxu0 }
  0xe7   : > { %v625_v60 = vadd.f32 %v1880_v24, %v379_v53  ;;  %v395_v18 = vadd.f32 %v1874_v23, %v2253_v10 }
  0xe8   : > { %v386_v25 = vpop.f32.mrf.mxu1  ;;  %v594_v26 = vpop.f32.mrf.mxu0 }
  0xe9   : > { %v623_v0 = vadd.f32 %v594_v26, %v371_v57  ;;  %v387_v24 = vadd.f32 %v386_v25, %v2255_v11 }
  0xea   : > { %v1889_v27 = vpop.f32.mrf.mxu1 }
  0xeb   : > { %v746_v58 = vadd.f32 %v1889_v27, %v624_v52 }
  0xec   : > { %v713_v28 = vpop.f32.mrf.mxu1 }
  0xed   : > { %v1883_v29 = vpop.f32.mrf.mxu0  ;;  %v744_v61 = vadd.f32 %v713_v28, %v622_v56 }
  0xee   : > { %v1890_v30 = vpop.f32.mrf.mxu1  ;;  %v628_v17 = vadd.f32 %v1883_v29, %v392_v1 }
  0xef   : > { %v607_v31 = vpop.f32.mrf.mxu0  ;;  %v747_v3 = vadd.f32 %v1890_v30, %v625_v60 }
  0xf0   : > { %v716_v32 = vpop.f32.mrf.mxu1  ;;  %v626_v22 = vadd.f32 %v607_v31, %v384_v4 }
  0xf1   : > { %v1884_v34 = vpop.f32.mrf.mxu0  ;;  %v745_v12 = vadd.f32 %v716_v32, %v623_v0 }
  0xf2   : > { %v1893_v35 = vpop.f32.mrf.mxu1 }
  0xf3   : > { %v610_v36 = vpop.f32.mrf.mxu0  ;;  %v750_v27 = vadd.f32 %v1893_v35, %v628_v17 }
  0xf4   : > { %v729_v37 = vpop.f32.mrf.mxu1  ;;  %v627_v10 = vadd.f32 %v610_v36, %v387_v24 }
  0xf5   : > { %v1899_v38 = vpop.f32.mrf.mxu0  ;;  %v748_v28 = vadd.f32 %v729_v37, %v626_v22  ;;  %v1806_v37 = vld [vmem:[%s2298_s2] ss:$0 sm:$0xff] }
  0xf6   : > { %v1894_v39 = vpop.f32.mrf.mxu1  ;;  %v864_v2 = vadd.f32 %v1899_v38, %v746_v58  ;;  %v629_v38 = vadd.f32 %v1884_v34, %v395_v18 }
  0xf7   : > { %v831_v40 = vpop.f32.mrf.mxu0 }
  0xf8   : > { %v2257_v42 = vpop.f32.mrf.mxu1  ;;  %v862_v9 = vadd.f32 %v831_v40, %v744_v61  ;;  %v751_v46 = vadd.f32 %v1894_v39, %v629_v38 }
  0xf9   : > { %v1900_v41 = vpop.f32.mrf.mxu0  ;;  %v749_v35 = vadd.f32 %v2257_v42, %v627_v10 }
  0xfa   : > { %v1909_v45 = vpop.f32.mrf.mxu1  ;;  %v865_v19 = vadd.f32 %v1900_v41, %v747_v3 }
  0xfb   : > { %v834_v43 = vpop.f32.mrf.mxu0  ;;  %v1097_v13 = vadd.f32 %v1909_v45, %v864_v2 }
  0xfc   : > { %v1064_v47 = vpop.f32.mrf.mxu1  ;;  %v863_v20 = vadd.f32 %v834_v43, %v745_v12 }
  0xfd   : > { %v1903_v33 = vpop.f32.mrf.mxu0  ;;  %v1095_v44 = vadd.f32 %v1064_v47, %v862_v9 }
  0xfe   : > { %v1910_v50 = vpop.f32.mrf.mxu1  ;;  %v868_v31 = vadd.f32 %v1903_v33, %v750_v27 }
  0xff   : > { %v847_v16 = vpop.f32.mrf.mxu0  ;;  %v1098_v21 = vadd.f32 %v1910_v50, %v865_v19 }
 0x100   : > { %v1067_v55 = vpop.f32.mrf.mxu1  ;;  %v866_v43 = vadd.f32 %v847_v16, %v748_v28 }
 0x101   : > { %v2259_v48 = vpop.f32.mrf.mxu0  ;;  %v1096_v29 = vadd.f32 %v1067_v55, %v863_v20 }
 0x102   : > { %v1913_v63 = vpop.f32.mrf.mxu1  ;;  %v869_v33 = vadd.f32 %v2259_v48, %v751_v46 }
 0x103   : > { %v2261_v51 = vpop.f32.mrf.mxu0  ;;  %v1101_v50 = vadd.f32 %v1913_v63, %v868_v31 }
 0x104   : > { %v1080_v6 = vpop.f32.mrf.mxu1  ;;  %v867_v56 = vadd.f32 %v2261_v51, %v749_v35 }
 0x105   : > { %v1919_v54 = vpop.f32.mrf.mxu0  ;;  %v1099_v53 = vadd.f32 %v1080_v6, %v866_v43 }
 0x106   : > { %v1914_v15 = vpop.f32.mrf.mxu1  ;;  %v1215_v8 = vadd.f32 %v1919_v54, %v1097_v13 }
 0x107   : > { %v1182_v59 = vpop.f32.mrf.mxu0  ;;  %v1102_v60 = vadd.f32 %v1914_v15, %v869_v33 }
 0x108   : > { %v1083_v7 = vpop.f32.mrf.mxu1  ;;  %v1213_v40 = vadd.f32 %v1182_v59, %v1095_v44 }
 0x109   : > { %v1920_v62 = vpop.f32.mrf.mxu0  ;;  %v1100_v48 = vadd.f32 %v1083_v7, %v867_v56 }
 0x10a   : > { %v1929_v32 = vpop.f32.mrf.mxu1  ;;  %v1216_v11 = vadd.f32 %v1920_v62, %v1098_v21 }
 0x10b   : > { %v1185_v5 = vpop.f32.mrf.mxu0  ;;  %v1337_v45 = vadd.f32 %v1929_v32, %v1215_v8 }
 0x10c   : > { %v1304_v41 = vpop.f32.mrf.mxu1  ;;  %v1214_v49 = vadd.f32 %v1185_v5, %v1096_v29 }
 0x10d   : > { %v1923_v14 = vpop.f32.mrf.mxu0  ;;  %v1335_v25 = vadd.f32 %v1304_v41, %v1213_v40 }
 0x10e   : > { %v1930_v34 = vpop.f32.mrf.mxu1  ;;  %v1219_v59 = vadd.f32 %v1923_v14, %v1101_v50 }
 0x10f   : > { %v1198_v26 = vpop.f32.mrf.mxu0  ;;  %v1338_v36 = vadd.f32 %v1930_v34, %v1216_v11 }
 0x110   : > { %v1307_v42 = vpop.f32.mrf.mxu1  ;;  %v1217_v63 = vadd.f32 %v1198_v26, %v1099_v53 }
 0x111   : > { %v1924_v30 = vpop.f32.mrf.mxu0  ;;  %v1336_v55 = vadd.f32 %v1307_v42, %v1214_v49 }
 0x112   : > { %v1933_v58 = vpop.f32.mrf.mxu1  ;;  %v1220_v5 = vadd.f32 %v1924_v30, %v1102_v60 }
 0x113   : > { %v1201_v23 = vpop.f32.mrf.mxu0  ;;  %v1341_v4 = vadd.f32 %v1933_v58, %v1219_v59 }
 0x114   : > { %v1320_v1 = vpop.f32.mrf.mxu1  ;;  %v1218_v14 = vadd.f32 %v1201_v23, %v1100_v48 }
 0x115   : > { %v1939_v47 = vpop.f32.mrf.mxu0  ;;  %v1339_v9 = vadd.f32 %v1320_v1, %v1217_v63 }
 0x116   : > { %v1566_v52 = vadd.f32 %v1939_v47, %v1337_v45  ;;  %v1934_v51 = vpop.f32.mrf.mxu1 }
 0x117   : > { %v1533_v39 = vpop.f32.mrf.mxu0  ;;  %v1342_v17 = vadd.f32 %v1934_v51, %v1220_v5 }
 0x118   : > { %v1580_v16 = vadd.f32 %v1806_v37, %v1566_v52  ;;  %v1564_v54 = vadd.f32 %v1533_v39, %v1335_v25  ;;  %v1323_v13 = vpop.f32.mrf.mxu1 }
 0x119   : > { %v1940_v57 = vpop.f32.mrf.mxu0  ;;  %v1340_v22 = vadd.f32 %v1323_v13, %v1218_v14 }
 0x11a   : > { %1589 = vst.msk [vmem:[%s2273_s16 + $0x10] sm:$0xff] %vm1586_vm5, %v1580_v16  ;;  %v1578_v61 = vadd.f32 %v1806_v37, %v1564_v54  ;;  %v1567_v62 = vadd.f32 %v1940_v57, %v1338_v36 }
 0x11b   : > { %v1536_v0 = vpop.f32.mrf.mxu0 }
 0x11c   : > { %1587 = vst.msk [vmem:[%s2273_s16] sm:$0xff] %vm1586_vm5, %v1578_v61  ;;  %v1581_v2 = vadd.f32 %v1806_v37, %v1567_v62  ;;  %v1565_v3 = vadd.f32 %v1536_v0, %v1336_v55 }
 0x11d   : > { %v1943_v12 = vpop.f32.mrf.mxu0 }
 0x11e   : > { %1590 = vst.msk [vmem:[%s2273_s16 + $0x18] sm:$0xff] %vm1586_vm5, %v1581_v2  ;;  %v1579_v6 = vadd.f32 %v1806_v37, %v1565_v3  ;;  %v1570_v15 = vadd.f32 %v1943_v12, %v1341_v4 }
 0x11f   : > { %v1549_v18 = vpop.f32.mrf.mxu0 }
 0x120   : > { %1588 = vst.msk [vmem:[%s2273_s16 + $0x8] sm:$0xff] %vm1586_vm5, %v1579_v6  ;;  %v1584_v19 = vadd.f32 %v1806_v37, %v1570_v15  ;;  %v1568_v44 = vadd.f32 %v1549_v18, %v1339_v9 }
 0x121   : > { %v1944_v24 = vpop.f32.mrf.mxu0 }
 0x122   : > { %1593 = vst.msk [vmem:[%s2273_s16 + $0x30] sm:$0xff] %vm1586_vm5, %v1584_v19  ;;  %v1582_v26 = vadd.f32 %v1806_v37, %v1568_v44  ;;  %v1571_v7 = vadd.f32 %v1944_v24, %v1342_v17 }
 0x123   : > { %v1552_v20 = vpop.f32.mrf.mxu0 }
 0x124   : > { %1591 = vst.msk [vmem:[%s2273_s16 + $0x20] sm:$0xff] %vm1586_vm5, %v1582_v26  ;;  %v1585_v27 = vadd.f32 %v1806_v37, %v1571_v7  ;;  %v1569_v8 = vadd.f32 %v1552_v20, %v1340_v22 }
 0x126   : > { %1594 = vst.msk [vmem:[%s2273_s16 + $0x38] sm:$0xff] %vm1586_vm5, %v1585_v27  ;;  %v1583_v21 = vadd.f32 %v1806_v37, %v1569_v8 }
 0x128   : > { %1592 = vst.msk [vmem:[%s2273_s16 + $0x28] sm:$0xff] %vm1586_vm5, %v1583_v21 }
 0x129 PF: > { %s13_s12 = sadd.s32 1, %s2000_s12  }
 0x12a   : > { %p10_p4 = scmp.ge.s32.totalorder %s13_s12, 4  }
 0x12c   :  { %12 = sbr.rel (!%p10_p4) target bundleno = 1 (0x1), region = 67 }

</bundles_post_ra>
